<compile_context>
chip_gen: v6e
topology: v6e:2x2x1
jax: 0.10.0
libtpu: 0.0.40
codegen_flags: <defaults>
</compile_context>

<pallas_src>
import functools

import numpy as np
import jax
import jax.numpy as jnp
from jax.experimental import pallas as pl
from jax.experimental.pallas import tpu as pltpu


def _gaussian_1d(win_size: int, sigma: float) -> np.ndarray:
    coords = np.arange(win_size, dtype=np.float64) - win_size // 2
    g = np.exp(-(coords ** 2) / (2.0 * sigma ** 2))
    g = g / g.sum()
    return g.astype(np.float32)


def _ssim_block_kernel(x_ref, y_ref, bt_ref, o_ref, *, nb, H, W, Hout, Wout,
                       tile_w, taps, C1, C2, nonnegative_ssim, h_filter_first):
    win = len(taps)
    halo = win - 1

    xv = x_ref[...]                       # (nb, H, W) f32
    yv = y_ref[...]                       # (nb, H, W) f32

    # Five moments whose Gaussian-filtered versions SSIM needs, stacked along
    # the (leading, untiled) plane axis so the whole block is filtered together.
    prods = jnp.concatenate([xv, yv, xv * xv, yv * yv, xv * yv], axis=0)  # (5nb,H,W)

    def h_filter(a, rows_out):
        # "valid" 11-tap shift-accumulate along sublanes (H direction), VPU/XLU.
        acc = taps[0] * a[:, 0:rows_out, :]
        for k in range(1, win):
            acc = acc + taps[k] * a[:, k:k + rows_out, :]
        return acc

    def w_filter(flat):
        # Halo-tiled banded matmul along lanes (W direction): each <=tile_w-wide
        # output tile reads tile_w+halo input columns -> 2*(tile_w+halo) MACs per
        # output element instead of 2*W with a dense (W, Wout) band matrix.
        bt = bt_ref[...]                                   # (tile_w+halo, tile_w)
        outs = []
        c0 = 0
        while c0 < Wout:
            tw = min(tile_w, Wout - c0)
            chunk = flat[:, c0:c0 + tw + halo]             # lane-aligned start
            outs.append(jnp.dot(chunk, bt[:tw + halo, :tw],
                                preferred_element_type=jnp.float32))
            c0 += tw
        return outs[0] if len(outs) == 1 else jnp.concatenate(outs, axis=1)

    if h_filter_first:
        # Saves 10/H of MXU flops and shrinks intermediates; selected only when
        # the reshape below is sublane-tile aligned (or nothing is aligned).
        hf = h_filter(prods, Hout)                         # (5nb, Hout, W)
        filt = w_filter(hf.reshape(5 * nb * Hout, W))      # (5nb*Hout, Wout)
        filt = filt.reshape(5 * nb, Hout, Wout)
    else:
        # Free reshape when H % 8 == 0; the H filter then runs on Wout lanes.
        t = w_filter(prods.reshape(5 * nb * H, W))         # (5nb*H, Wout)
        t = t.reshape(5 * nb, H, Wout)
        filt = h_filter(t, Hout)                           # (5nb, Hout, Wout)

    mu1 = filt[0 * nb:1 * nb]
    mu2 = filt[1 * nb:2 * nb]
    ex2 = filt[2 * nb:3 * nb]
    ey2 = filt[3 * nb:4 * nb]
    exy = filt[4 * nb:5 * nb]

    mu1_sq = mu1 * mu1
    mu2_sq = mu2 * mu2
    mu1_mu2 = mu1 * mu2
    sigma1_sq = ex2 - mu1_sq
    sigma2_sq = ey2 - mu2_sq
    sigma12 = exy - mu1_mu2

    num = (2.0 * mu1_mu2 + C1) * (2.0 * sigma12 + C2)
    den = (mu1_sq + mu2_sq + C1) * (sigma1_sq + sigma2_sq + C2)
    # EUP approximate reciprocal + one cheap Newton step (den > 0 always):
    # relative error drops from ~1e-3 to ~1e-6, well inside the loss tolerance.
    r = pl.reciprocal(den, approx=True)
    r = r * (2.0 - den * r)
    ssim_map = num * r                                     # (nb, Hout, Wout)

    # Per-plane mean over the valid window, then ReLU (nonnegative_ssim).
    s = jnp.sum(ssim_map, axis=2)                          # (nb, Hout)
    s = jnp.sum(s, axis=1)                                 # (nb,)
    vals = s * (1.0 / float(Hout * Wout))
    if nonnegative_ssim:
        vals = jnp.maximum(vals, 0.0)
    o_ref[...] = vals.reshape(1, 1, nb)                    # lane-dense store


def _pick_block_planes(N, plane_bytes, s_target, requested=None):
    """Largest divisor of N that fits the per-input-block VMEM target and keeps
    at least two grid blocks (so both v7x TensorCores get work)."""
    target = max(1, int(s_target) // max(1, int(plane_bytes)))
    if requested is not None:
        target = min(target, int(requested))
    if N >= 2:
        target = min(target, N // 2)
    target = max(1, min(target, N))
    for d in range(target, 0, -1):
        if N % d == 0:
            return d
    return 1


def ssim_loss(x, y, *, data_range=1.0, nonnegative_ssim=True,
              win_size=11, win_sigma=1.5, block_planes=None):
    """x, y: (B, C, H, W) float32. Returns scalar loss = (1 - ssim) / B."""
    B, C, H, W = x.shape
    assert H >= win_size and W >= win_size, "spatial dims must be >= win_size"
    N = B * C
    Hout = H - win_size + 1
    Wout = W - win_size + 1
    halo = win_size - 1

    g = _gaussian_1d(win_size, win_sigma)
    C1 = (0.01 * data_range) ** 2
    C2 = (0.03 * data_range) ** 2

    # --- generation-aware VMEM budget -----------------------------------------
    # Intermediates per step ~= 4x (x/y double-buffered) + ~15x (prods + filter
    # stages) of one input block S = nb*H*W*4, so budget S ~ vmem_limit / 20.
    try:
        vmem_cap = int(pltpu.get_tpu_info().vmem_capacity_bytes)
    except Exception:
        vmem_cap = 64 * 1024 * 1024
    if vmem_cap >= 100 * 1024 * 1024:        # v5e / v6e: 128 MiB physical VMEM
        vmem_limit = 80 * 1024 * 1024
        s_target = 4 * 1024 * 1024
    else:                                     # v7x: 64 MiB per TensorCore
        vmem_limit = 48 * 1024 * 1024
        s_target = 7 * 256 * 1024             # 1.75 MiB

    plane_bytes = H * W * 4
    nb = _pick_block_planes(N, plane_bytes, s_target, block_planes)
    num_blocks = N // nb                      # nb divides N: no padding, no HBM copy

    # W-direction "valid" Gaussian filter as a halo-tiled banded matrix:
    # one (tile_w + 10, tile_w) band reused for every 128-wide output tile
    # (last partial tile uses a static sub-slice). <= ~69 KiB, so default
    # double-buffering of this resident operand is negligible.
    tile_w = min(128, Wout)
    Bt = np.zeros((tile_w + halo, tile_w), np.float32)
    for p in range(tile_w):
        Bt[p:p + win_size, p] = g

    # Compile-time choice of separable-filter ordering (see kernel docstring).
    h_filter_first = (Hout % 8 == 0) or (H % 8 != 0)

    # Normalize(0, 1): (v - 0) / 1 == identity, nothing to do.
    x3 = jnp.reshape(x, (N, H, W)).astype(jnp.float32)
    y3 = jnp.reshape(y, (N, H, W)).astype(jnp.float32)

    kernel = functools.partial(
        _ssim_block_kernel, nb=nb, H=H, W=W, Hout=Hout, Wout=Wout,
        tile_w=tile_w, taps=tuple(float(v) for v in g),
        C1=float(C1), C2=float(C2), nonnegative_ssim=nonnegative_ssim,
        h_filter_first=h_filter_first)

    per_plane = pl.pallas_call(
        kernel,
        out_shape=jax.ShapeDtypeStruct((num_blocks, 1, nb), jnp.float32),
        grid=(num_blocks,),
        in_specs=[
            pl.BlockSpec((nb, H, W), lambda i: (i, 0, 0)),        # x planes
            pl.BlockSpec((nb, H, W), lambda i: (i, 0, 0)),        # y planes
            pl.BlockSpec((tile_w + halo, tile_w), lambda i: (0, 0)),  # band tile
        ],
        out_specs=pl.BlockSpec((1, 1, nb), lambda i: (i, 0, 0)),  # lane-dense
        compiler_params=pltpu.CompilerParams(
            dimension_semantics=("parallel",),     # shards blocks across v7x TCs
            vmem_limit_bytes=vmem_limit),
    )(x3, y3, jnp.asarray(Bt))

    ssim_per_plane = per_plane.reshape(-1)        # exactly N values, no padding
    ssim_val = jnp.mean(ssim_per_plane)
    return (1.0 - ssim_val) / jnp.float32(B)


def _ssim_loss_ref(x, y, *, data_range=1.0, nonnegative_ssim=True,
                   win_size=11, win_sigma=1.5):
    """Pure-JAX reference (same math, no Pallas) for a sanity check."""
    B, C, H, W = x.shape
    g = jnp.asarray(_gaussian_1d(win_size, win_sigma))
    C1 = (0.01 * data_range) ** 2
    C2 = (0.03 * data_range) ** 2

    def gfilt(img):  # img: (B, C, H, W), valid separable filter
        Hc = img.shape[2]
        acc = g[0] * img[:, :, 0:Hc - win_size + 1, :]
        for k in range(1, win_size):
            acc = acc + g[k] * img[:, :, k:k + Hc - win_size + 1, :]
        Wc = acc.shape[3]
        acc2 = g[0] * acc[:, :, :, 0:Wc - win_size + 1]
        for k in range(1, win_size):
            acc2 = acc2 + g[k] * acc[:, :, :, k:k + Wc - win_size + 1]
        return acc2

    mu1, mu2 = gfilt(x), gfilt(y)
    s1 = gfilt(x * x) - mu1 * mu1
    s2 = gfilt(y * y) - mu2 * mu2
    s12 = gfilt(x * y) - mu1 * mu2
    cs = (2 * s12 + C2) / (s1 + s2 + C2)
    ssim_map = ((2 * mu1 * mu2 + C1) / (mu1 * mu1 + mu2 * mu2 + C1)) * cs
    ssim_pc = jnp.mean(ssim_map, axis=(2, 3))
    if nonnegative_ssim:
        ssim_pc = jnp.maximum(ssim_pc, 0.0)
    return (1.0 - jnp.mean(ssim_pc)) / B


if __name__ == "__main__":
    key = jax.random.PRNGKey(0)
    kx, ky = jax.random.split(key)
    B, C, H, W = 2, 4, 16, 16
    x = jax.random.uniform(kx, (B, C, H, W), dtype=jnp.float32)
    y = jax.random.uniform(ky, (B, C, H, W), dtype=jnp.float32)

    # N = 8 planes -> nb = 4, num_blocks = 2: exercises the pipelined grid and
    # the "parallel" axis without any input padding.
    loss = jax.block_until_ready(ssim_loss(x, y))
    ref = jax.block_until_ready(_ssim_loss_ref(x, y))
    assert np.allclose(np.asarray(loss), np.asarray(ref), rtol=2e-3, atol=2e-3), (
        loss, ref)
    print("KERNEL_OK")
</pallas_src>

<mosaic_0001>
module attributes {stable_mosaic.version = 11 : i64} {
  func.func @_ssim_block_kernel(%arg0: i32, %arg1: memref<4x16x16xf32, #tpu.memory_space<vmem>>, %arg2: memref<4x16x16xf32, #tpu.memory_space<vmem>>, %arg3: memref<16x6xf32, #tpu.memory_space<vmem>>, %arg4: memref<1x1x4xf32, #tpu.memory_space<vmem>>) attributes {dimension_semantics = [#tpu.dimension_semantics<parallel>], iteration_bounds = array<i64: 2>, scalar_prefetch = 0 : i64, scratch_operands = 0 : i64, tpu.core_type = #tpu.core_type<tc>, window_params = [{transform_indices = @transform_0, window_bounds = array<i64: 4, 16, 16>}, {transform_indices = @transform_1, window_bounds = array<i64: 4, 16, 16>}, {pipeline_mode = #tpu.pipeline_mode<synchronous>, transform_indices = @transform_2, window_bounds = array<i64: 16, 6>}, {transform_indices = @transform_3, window_bounds = array<i64: 1, 1, 4>}]} {
    %c0 = arith.constant 0 : index
    %c0_0 = arith.constant 0 : index
    %c0_1 = arith.constant 0 : index
    %0 = vector.load %arg1[%c0, %c0_0, %c0_1] : memref<4x16x16xf32, #tpu.memory_space<vmem>>, vector<4x16x16xf32>
    %c0_2 = arith.constant 0 : index
    %c0_3 = arith.constant 0 : index
    %c0_4 = arith.constant 0 : index
    %1 = vector.load %arg2[%c0_2, %c0_3, %c0_4] : memref<4x16x16xf32, #tpu.memory_space<vmem>>, vector<4x16x16xf32>
    %2 = arith.mulf %0, %0 : vector<4x16x16xf32>
    %3 = arith.mulf %1, %1 : vector<4x16x16xf32>
    %4 = arith.mulf %0, %1 : vector<4x16x16xf32>
    %5 = tpu.concatenate %0, %1, %2, %3, %4 in 0 : vector<4x16x16xf32>, vector<4x16x16xf32>, vector<4x16x16xf32>, vector<4x16x16xf32>, vector<4x16x16xf32> -> vector<20x16x16xf32>
    %6 = vector.shape_cast %5 : vector<20x16x16xf32> to vector<320x16xf32>
    %c0_5 = arith.constant 0 : index
    %c0_6 = arith.constant 0 : index
    %7 = vector.load %arg3[%c0_5, %c0_6] : memref<16x6xf32, #tpu.memory_space<vmem>>, vector<16x6xf32>
    %cst = arith.constant dense<0.000000e+00> : vector<320x6xf32>
    %8 = tpu.matmul %6, %7, %cst {dimension_numbers = #tpu.dot_dimension_numbers<[1], [0], [0], [1], [0, 0, 1, 1], [], []>} : vector<320x16xf32>, vector<16x6xf32>, vector<320x6xf32> -> vector<320x6xf32>
    %9 = vector.shape_cast %8 : vector<320x6xf32> to vector<20x16x6xf32>
    %10 = vector.extract_strided_slice %9 {offsets = [0, 0, 0], sizes = [20, 6, 6], strides = [1, 1, 1]} : vector<20x16x6xf32> to vector<20x6x6xf32>
    %cst_7 = arith.constant 0.00102838012 : f32
    %11 = vector.broadcast %cst_7 : f32 to vector<20x6x6xf32>
    %12 = arith.mulf %11, %10 : vector<20x6x6xf32>
    %13 = vector.extract_strided_slice %9 {offsets = [0, 1, 0], sizes = [20, 6, 6], strides = [1, 1, 1]} : vector<20x16x6xf32> to vector<20x6x6xf32>
    %cst_8 = arith.constant 0.00759875821 : f32
    %14 = vector.broadcast %cst_8 : f32 to vector<20x6x6xf32>
    %15 = arith.mulf %14, %13 : vector<20x6x6xf32>
    %16 = arith.addf %12, %15 : vector<20x6x6xf32>
    %17 = vector.extract_strided_slice %9 {offsets = [0, 2, 0], sizes = [20, 6, 6], strides = [1, 1, 1]} : vector<20x16x6xf32> to vector<20x6x6xf32>
    %cst_9 = arith.constant 0.0360007733 : f32
    %18 = vector.broadcast %cst_9 : f32 to vector<20x6x6xf32>
    %19 = arith.mulf %18, %17 : vector<20x6x6xf32>
    %20 = arith.addf %16, %19 : vector<20x6x6xf32>
    %21 = vector.extract_strided_slice %9 {offsets = [0, 3, 0], sizes = [20, 6, 6], strides = [1, 1, 1]} : vector<20x16x6xf32> to vector<20x6x6xf32>
    %cst_10 = arith.constant 0.109360687 : f32
    %22 = vector.broadcast %cst_10 : f32 to vector<20x6x6xf32>
    %23 = arith.mulf %22, %21 : vector<20x6x6xf32>
    %24 = arith.addf %20, %23 : vector<20x6x6xf32>
    %25 = vector.extract_strided_slice %9 {offsets = [0, 4, 0], sizes = [20, 6, 6], strides = [1, 1, 1]} : vector<20x16x6xf32> to vector<20x6x6xf32>
    %cst_11 = arith.constant 0.213005543 : f32
    %26 = vector.broadcast %cst_11 : f32 to vector<20x6x6xf32>
    %27 = arith.mulf %26, %25 : vector<20x6x6xf32>
    %28 = arith.addf %24, %27 : vector<20x6x6xf32>
    %29 = vector.extract_strided_slice %9 {offsets = [0, 5, 0], sizes = [20, 6, 6], strides = [1, 1, 1]} : vector<20x16x6xf32> to vector<20x6x6xf32>
    %cst_12 = arith.constant 0.266011715 : f32
    %30 = vector.broadcast %cst_12 : f32 to vector<20x6x6xf32>
    %31 = arith.mulf %30, %29 : vector<20x6x6xf32>
    %32 = arith.addf %28, %31 : vector<20x6x6xf32>
    %33 = vector.extract_strided_slice %9 {offsets = [0, 6, 0], sizes = [20, 6, 6], strides = [1, 1, 1]} : vector<20x16x6xf32> to vector<20x6x6xf32>
    %cst_13 = arith.constant 0.213005543 : f32
    %34 = vector.broadcast %cst_13 : f32 to vector<20x6x6xf32>
    %35 = arith.mulf %34, %33 : vector<20x6x6xf32>
    %36 = arith.addf %32, %35 : vector<20x6x6xf32>
    %37 = vector.extract_strided_slice %9 {offsets = [0, 7, 0], sizes = [20, 6, 6], strides = [1, 1, 1]} : vector<20x16x6xf32> to vector<20x6x6xf32>
    %cst_14 = arith.constant 0.109360687 : f32
    %38 = vector.broadcast %cst_14 : f32 to vector<20x6x6xf32>
    %39 = arith.mulf %38, %37 : vector<20x6x6xf32>
    %40 = arith.addf %36, %39 : vector<20x6x6xf32>
    %41 = vector.extract_strided_slice %9 {offsets = [0, 8, 0], sizes = [20, 6, 6], strides = [1, 1, 1]} : vector<20x16x6xf32> to vector<20x6x6xf32>
    %cst_15 = arith.constant 0.0360007733 : f32
    %42 = vector.broadcast %cst_15 : f32 to vector<20x6x6xf32>
    %43 = arith.mulf %42, %41 : vector<20x6x6xf32>
    %44 = arith.addf %40, %43 : vector<20x6x6xf32>
    %45 = vector.extract_strided_slice %9 {offsets = [0, 9, 0], sizes = [20, 6, 6], strides = [1, 1, 1]} : vector<20x16x6xf32> to vector<20x6x6xf32>
    %cst_16 = arith.constant 0.00759875821 : f32
    %46 = vector.broadcast %cst_16 : f32 to vector<20x6x6xf32>
    %47 = arith.mulf %46, %45 : vector<20x6x6xf32>
    %48 = arith.addf %44, %47 : vector<20x6x6xf32>
    %49 = vector.extract_strided_slice %9 {offsets = [0, 10, 0], sizes = [20, 6, 6], strides = [1, 1, 1]} : vector<20x16x6xf32> to vector<20x6x6xf32>
    %cst_17 = arith.constant 0.00102838012 : f32
    %50 = vector.broadcast %cst_17 : f32 to vector<20x6x6xf32>
    %51 = arith.mulf %50, %49 : vector<20x6x6xf32>
    %52 = arith.addf %48, %51 : vector<20x6x6xf32>
    %53 = vector.extract_strided_slice %52 {offsets = [0, 0, 0], sizes = [4, 6, 6], strides = [1, 1, 1]} : vector<20x6x6xf32> to vector<4x6x6xf32>
    %54 = vector.extract_strided_slice %52 {offsets = [4, 0, 0], sizes = [4, 6, 6], strides = [1, 1, 1]} : vector<20x6x6xf32> to vector<4x6x6xf32>
    %55 = vector.extract_strided_slice %52 {offsets = [8, 0, 0], sizes = [4, 6, 6], strides = [1, 1, 1]} : vector<20x6x6xf32> to vector<4x6x6xf32>
    %56 = vector.extract_strided_slice %52 {offsets = [12, 0, 0], sizes = [4, 6, 6], strides = [1, 1, 1]} : vector<20x6x6xf32> to vector<4x6x6xf32>
    %57 = vector.extract_strided_slice %52 {offsets = [16, 0, 0], sizes = [4, 6, 6], strides = [1, 1, 1]} : vector<20x6x6xf32> to vector<4x6x6xf32>
    %58 = arith.mulf %53, %53 : vector<4x6x6xf32>
    %59 = arith.mulf %54, %54 : vector<4x6x6xf32>
    %60 = arith.mulf %53, %54 : vector<4x6x6xf32>
    %61 = arith.subf %55, %58 : vector<4x6x6xf32>
    %62 = arith.subf %56, %59 : vector<4x6x6xf32>
    %63 = arith.subf %57, %60 : vector<4x6x6xf32>
    %cst_18 = arith.constant 2.000000e+00 : f32
    %64 = vector.broadcast %cst_18 : f32 to vector<4x6x6xf32>
    %65 = arith.mulf %64, %60 : vector<4x6x6xf32>
    %cst_19 = arith.constant 9.99999974E-5 : f32
    %66 = vector.broadcast %cst_19 : f32 to vector<4x6x6xf32>
    %67 = arith.addf %65, %66 : vector<4x6x6xf32>
    %cst_20 = arith.constant 2.000000e+00 : f32
    %68 = vector.broadcast %cst_20 : f32 to vector<4x6x6xf32>
    %69 = arith.mulf %68, %63 : vector<4x6x6xf32>
    %cst_21 = arith.constant 8.99999984E-4 : f32
    %70 = vector.broadcast %cst_21 : f32 to vector<4x6x6xf32>
    %71 = arith.addf %69, %70 : vector<4x6x6xf32>
    %72 = arith.mulf %67, %71 : vector<4x6x6xf32>
    %73 = arith.addf %58, %59 : vector<4x6x6xf32>
    %cst_22 = arith.constant 9.99999974E-5 : f32
    %74 = vector.broadcast %cst_22 : f32 to vector<4x6x6xf32>
    %75 = arith.addf %73, %74 : vector<4x6x6xf32>
    %76 = arith.addf %61, %62 : vector<4x6x6xf32>
    %cst_23 = arith.constant 8.99999984E-4 : f32
    %77 = vector.broadcast %cst_23 : f32 to vector<4x6x6xf32>
    %78 = arith.addf %76, %77 : vector<4x6x6xf32>
    %79 = arith.mulf %75, %78 : vector<4x6x6xf32>
    %80 = tpu.reciprocal %79 {approx = true} : vector<4x6x6xf32> -> vector<4x6x6xf32>
    %81 = arith.mulf %79, %80 : vector<4x6x6xf32>
    %cst_24 = arith.constant 2.000000e+00 : f32
    %82 = vector.broadcast %cst_24 : f32 to vector<4x6x6xf32>
    %83 = arith.subf %82, %81 : vector<4x6x6xf32>
    %84 = arith.mulf %80, %83 : vector<4x6x6xf32>
    %85 = arith.mulf %72, %84 : vector<4x6x6xf32>
    %cst_25 = arith.constant dense<0.000000e+00> : vector<4x6xf32>
    %86 = vector.multi_reduction <add>, %85, %cst_25 [2] : vector<4x6x6xf32> to vector<4x6xf32>
    %cst_26 = arith.constant dense<0.000000e+00> : vector<4xf32>
    %87 = vector.multi_reduction <add>, %86, %cst_26 [1] : vector<4x6xf32> to vector<4xf32>
    %cst_27 = arith.constant 0.027777778 : f32
    %88 = vector.broadcast %cst_27 : f32 to vector<4xf32>
    %89 = arith.mulf %87, %88 : vector<4xf32>
    %cst_28 = arith.constant 0.000000e+00 : f32
    %90 = vector.broadcast %cst_28 : f32 to vector<4xf32>
    %91 = arith.maximumf %89, %90 : vector<4xf32>
    %92 = vector.shape_cast %91 : vector<4xf32> to vector<1x1x4xf32>
    %c0_29 = arith.constant 0 : index
    %c0_30 = arith.constant 0 : index
    %c0_31 = arith.constant 0 : index
    %93 = vector.load %arg4[%c0_29, %c0_30, %c0_31] : memref<1x1x4xf32, #tpu.memory_space<vmem>>, vector<1x1x4xf32>
    tpu.vector_store %arg4[%c0_29, %c0_30, %c0_31], %92 {strides = array<i32>} : memref<1x1x4xf32, #tpu.memory_space<vmem>>, vector<1x1x4xf32>,
    return
  }
  func.func @transform_0(%arg0: i32) -> (i32, i32, i32) {
    %c0_i32 = arith.constant 0 : i32
    %c0_i32_0 = arith.constant 0 : i32
    %c0_i32_1 = arith.constant 0 : i32
    return %arg0, %c0_i32, %c0_i32_0 : i32, i32, i32
  }
  func.func @transform_1(%arg0: i32) -> (i32, i32, i32) {
    %c0_i32 = arith.constant 0 : i32
    %c0_i32_0 = arith.constant 0 : i32
    %c0_i32_1 = arith.constant 0 : i32
    return %arg0, %c0_i32, %c0_i32_0 : i32, i32, i32
  }
  func.func @transform_2(%arg0: i32) -> (i32, i32) {
    %c0_i32 = arith.constant 0 : i32
    %c0_i32_0 = arith.constant 0 : i32
    %c0_i32_1 = arith.constant 0 : i32
    return %c0_i32, %c0_i32_0 : i32, i32
  }
  func.func @transform_3(%arg0: i32) -> (i32, i32, i32) {
    %c0_i32 = arith.constant 0 : i32
    %c0_i32_0 = arith.constant 0 : i32
    %c0_i32_1 = arith.constant 0 : i32
    return %arg0, %c0_i32, %c0_i32_0 : i32, i32, i32
  }
}

</mosaic_0001>

<bundles_post_ra>
// kernel: tpu_custom_call.1
= control target key start
LH: loop header
LB: loop body
LE: loop exit
PB: predicated region body
PF: predicated region fallthrough
CT: control target
= control target key end

     0   :  { %8 = vsyncpa [#allocation3], 0  ;;  %s3602_s0 = inlined_call_operand.hbm [shape: f32[8,16,16], index: 0, kind: input, shape index: {}]   ;;  %s3603_s1 = inlined_call_operand.hbm [shape: f32[8,16,16], index: 1, kind: input, shape index: {}]   ;;  %s3604_s2 = inlined_call_operand.vmem [shape: f32[16,6], index: 2, kind: input, shape index: {}]   ;;  %s3605_s3 = inlined_call_operand.hbm [shape: f32[2,1,4], index: 3, kind: output, shape index: {}]  }
   0x1   :  { %10 = vsyncpa [#allocation3 + $0x1], 0 }
   0x2   :  { %11 = vsyncpa [#allocation6], 0 }
   0x3   :  { %13 = vsyncpa [#allocation6 + $0x1], 0 }
   0x4   :  { %14 = vsyncpa [#allocation4], 0 }
   0x5   :  { %16 = vsyncpa [#allocation4 + $0x1], 0  ;;  %s2490_s12 = smov 0   ;;  %s2492_s13 = smov 0  }
   0x6   :  { %s2494_s14 = smov 0   ;;  %s2496_s15 = smov 0  }
   0x7 LB: > { %s2511_s16 = sadd.s32 4294967295, %s2463_s15   ;;  %s2107_s17 = sadd.s32 4294967294, %s2463_s15   ;;  %s2463_s15 = sphi %s2496_s15, %s3850_s15   ;;  %s2459_s14 = sphi %s2494_s14, %s3849_s14   ;;  %s2455_s13 = sphi %s2492_s13, %s3848_s13   ;;  %s2451_s12 = sphi %s2490_s12, %s3847_s12  }
   0x8   : > { %s2515_s18 = sadd.s32 1, %s2463_s15   ;;  %s29_s19 = sadd.s32 1, %s2459_s14 }
   0x9   : > { %s26_s20 = ssub.s32 %s2463_s15, %s2515_s18  ;;  %p36_p0 = scmp.ne.s32.totalorder %s2459_s14, %s2455_s13 }
   0xa   : > { %p27_p1 = scmp.eq.s32.totalorder %s26_s20, 0  ;;  %p37_p2 = scmp.eq.s32.totalorder %s2463_s15, 0 }
   0xb   : > { %p42_p3 = scmp.ne.s32.totalorder %s2455_s13, %s2451_s12  ;;  %p43_p4 = scmp.eq.s32.totalorder %s2511_s16, 0 }
   0xc   : > { %s2527_s21 = scalar_select %p27_p1, %s2459_s14, %s29_s19  }
   0xd   : > { %p2529_p5 = por %p37_p2, %p36_p0  ;;  %p2533_p6 = por %p43_p4, %p42_p3 }
   0xe   : > { %p113_p7 = scmp.eq.s32.totalorder %s2511_s16, 1  ;;  %p119_p8 = scmp.eq.s32.totalorder %s2107_s17, 1 }
   0xf   : > { %s3644_s23 = scalar_select %p2533_p6, 1, 0 }
  0x10   : > { %p2295_p10 = scmp.lt.s32.totalorder %s2463_s15, 2  ;;  %p2540_p11 = por %p113_p7, %p36_p0 }
  0x11   : > { %p2544_p12 = por %p119_p8, %p42_p3  ;;  %s2549_s26 = sand.u32 1, %s2459_s14  }
  0x12   : > { %s3645_s24 = scalar_select %p2540_p11, 1, 0 }
  0x13   : > { %s3646_s25 = scalar_select %p2544_p12, 1, 0 }
  0x14   : > { %s2165_s27 = sshll.u32 %s2463_s15, 10  ;;  %s2110_s28 = sshll.u32 %s2549_s26, 6 }
  0x15   : > { %s2558_s4 = scalar_lea.hbm %s3602_s0, %s2165_s27  ;;  %s146_s5 = scalar_lea.vmem [#allocation2], %s2110_s28 }
  0x16   : > { %s154_s6 = sshll.u32 %s146_s5, 4  ;;  %p2564_p13 = pnand %p2295_p10, %p2529_p5  ;;  %s2568_s6 = int_to_ptr.vmem [resolvable:$true] %s154_s6 }
  0x17   : > { %s143_s8 = scalar_lea.sflag [#allocation3], %s2549_s26  ;;  %s2339_s9 = scalar_lea.hbm %s2558_s4, 1024 }
  0x18   : > { %p2340_p0 = scmp.ne.s32.totalorder %s2558_s4, %s2339_s9  ;;  %p2341_p1 = pneg %p2564_p13 }
  0x19   : > { %s2344_s17 = scalar_lea.hbm %s3602_s0, 2048  ;;  %p2345_p4 = scmp.lt.s32.totalorder %s2558_s4, %s3602_s0 }
  0x1a   : > { %p2342_p2 = pnand %p2341_p1, %p2340_p0  ;;  %p2346_p5 = scmp.lt.s32.totalorder %s2344_s17, %s2339_s9 }
  0x1c   : > { %p2343_p3 = pneg %p2342_p2  ;;  %p2347_p7 = por %p2346_p5, %p2345_p4 }
  0x1e   : > { %p2348_p8 = pnand %p2347_p7, %p2343_p3 }
  0x20   : > { %2351 = shalt.err (!%p2348_p8)
}
  0x21   : > { %s2352_s22 = scalar_lea.vmem %s2568_s6, 1024  ;;  %s2465_s29 = smov [#allocation2]  }
  0x22   : > { %p2353_p10 = scmp.ne.s32.totalorder %s2568_s6, %s2352_s22  ;;  %s2357_s30 = sshll.u32 %s2465_s29, 4  ;;  %s2358_s30 = int_to_ptr.vmem [resolvable:$false] %s2357_s30 }
  0x23   : > { %s2359_s5 = scalar_lea.vmem %s2358_s30, 2048  ;;  %p2360_p9 = scmp.lt.s32.totalorder %s2568_s6, %s2358_s30 }
  0x24   : > { %p2355_p0 = pnand %p2353_p10, %p2341_p1  ;;  %p2361_p12 = scmp.lt.s32.totalorder %s2359_s5, %s2352_s22 }
  0x26   : > { %p2356_p2 = pneg %p2355_p0  ;;  %p2362_p11 = por %p2361_p12, %p2360_p9 }
  0x28   : > { %p2363_p4 = pnand %p2362_p11, %p2356_p2 }
  0x2a   : > { %2366 = shalt.err (!%p2363_p4)
}
  0x2b   : > { %s2466_s9 = smov 128   ;;  %s2467_s10 = smov 8  }
  0x2c   : > { %2287 = dma.hbm_to_vmem [thread:$0]  (!%p2564_p13), %s2558_s4, 1024, %s2568_s6, %s143_s8, %s2466_s9, %s2466_s9, %s2467_s10  }
  0x2d   : > { %p2118_p9 = scmp.ge.s32.totalorder %s2463_s15, 1  ;;  %p184_p11 = scmp.lt.s32.totalorder %s2463_s15, 3 }
  0x2e   : > { %s2611_s20 = scalar_lea.hbm %s3603_s1, %s2165_s27  ;;  %s168_s22 = scalar_lea.vmem [#allocation5], %s2110_s28 }
  0x2f   : > { %p2602_p12 = pnand %p2118_p9, %p184_p11  ;;  %s176_s29 = sshll.u32 %s168_s22, 4  ;;  %s2615_s29 = int_to_ptr.vmem [resolvable:$true] %s176_s29 }
  0x30   : > { %s165_s4 = scalar_lea.sflag [#allocation6], %s2549_s26  ;;  %s2367_s6 = scalar_lea.hbm %s2611_s20, 1024 }
  0x31   : > { %p2368_p3 = scmp.ne.s32.totalorder %s2611_s20, %s2367_s6  ;;  %s2372_s27 = scalar_lea.hbm %s3603_s1, 2048 }
  0x32   : > { %p2373_p8 = scmp.lt.s32.totalorder %s2611_s20, %s3603_s1  ;;  %p2374_p10 = scmp.lt.s32.totalorder %s2372_s27, %s2367_s6 }
  0x33   : > { %p2370_p5 = pnand %p2368_p3, %p2341_p1 }
  0x34   : > { %p2375_p0 = por %p2374_p10, %p2373_p8 }
  0x35   : > { %p2371_p7 = pneg %p2370_p5 }
  0x37   : > { %p2376_p2 = pnand %p2375_p0, %p2371_p7 }
  0x39   : > { %2379 = shalt.err (!%p2376_p2)
}
  0x3a   : > { %s2380_s26 = scalar_lea.vmem %s2615_s29, 1024  ;;  %s2468_s28 = smov [#allocation5]  }
  0x3b   : > { %p2381_p4 = scmp.ne.s32.totalorder %s2615_s29, %s2380_s26  ;;  %s2385_s19 = sshll.u32 %s2468_s28, 4  ;;  %s2386_s19 = int_to_ptr.vmem [resolvable:$false] %s2385_s19 }
  0x3c   : > { %s2387_s22 = scalar_lea.vmem %s2386_s19, 2048  ;;  %p2388_p3 = scmp.lt.s32.totalorder %s2615_s29, %s2386_s19 }
  0x3d   : > { %p2383_p9 = pnand %p2381_p4, %p2341_p1  ;;  %p2389_p5 = scmp.lt.s32.totalorder %s2387_s22, %s2380_s26 }
  0x3f   : > { %p2384_p11 = pneg %p2383_p9  ;;  %p2390_p6 = por %p2389_p5, %p2388_p3 }
  0x41   : > { %p2391_p8 = pnand %p2390_p6, %p2384_p11 }
  0x43   : > { %2394 = shalt.err (!%p2391_p8)
}
  0x44   : > { %2290 = dma.hbm_to_vmem [thread:$0]  (!%p2564_p13), %s2611_s20, 1024, %s2615_s29, %s165_s4, %s2466_s9, %s2466_s9, %s2467_s10  }
  0x45   : > { %188 = sbr.rel (%p2602_p12) target bundleno = 833 (0x341), region = 32 }
  0x4a   : > { %s2646_s6 = sand.u32 1, %s2455_s13   ;;  %p3649_p6 = scmp.ne.s32.totalorder %s3644_s23, 0 }
  0x4b   : > { %s2119_s8 = sshll.u32 %s2646_s6, 6  ;;  %s191_s30 = scalar_lea.sflag [#allocation3], %s2646_s6 }
  0x4c   : > { %s2650_s27 = scalar_lea.vmem [#allocation2], %s2119_s8 }
  0x4d   : > { %2438 = dma.done.wait (%p3649_p6), %s191_s30, 1024  }
  0x4e   : > { %2440 = vsyncadd (%p3649_p6), %s191_s30, 4294966272  ;;  %s200_s7 = scalar_lea.sflag [#allocation6], %s2646_s6  ;;  %s2657_s9 = scalar_lea.vmem [#allocation5], %s2119_s8 }
  0x4f   : > { %2442 = dma.done.wait (%p3649_p6), %s200_s7, 1024  }
  0x50   : > { %2444 = vsyncadd (%p3649_p6), %s200_s7, 4294966272  ;;  %v273_v0 = vld [vmem:[%s3604_s2 + $0x8] sm:$0xff]  ;;  %v272_v1 = vld [vmem:[%s3604_s2] sm:$0xff]  ;;  %vm274_vm0 = vcmask 130048   ;;  %vm960_vm1 = vcmask 1044480   ;;  %vm1141_vm2 = vcmask 1043456  }
  0x51   : > { %2210 = vmatprep.subr.mxu0 %v273_v0  ;;  %2274 = vmatprep.subr.mxu1 %v273_v0  ;;  %v2670_v2 = vld [vmem:[%s2650_s27 + $0x20] sm:$0xff]  ;;  %v2678_v5 = vld [vmem:[%s2650_s27 + $0x28] sm:$0xff]  ;;  %v2684_v8 = vld [vmem:[%s2650_s27 + $0x30] sm:$0xff]  ;;  %vm1322_vm3 = vcmask 1042432   ;;  %vm1423_vm4 = vcmask 1041408   ;;  %vm1524_vm5 = vcmask 1040384  }
  0x52   : > { %2211 = vmatpush3.msra.mxu0 %v273_v0  ;;  %2276 = vmatpush3.msra.mxu1 %v273_v0  ;;  %v2673_v3 = vld [vmem:[%s2650_s27] sm:$0xff]  ;;  %v252_v4 = vmul.f32 %v2670_v2, %v2670_v2  ;;  %v233_v6 = vld [vmem:[%s2650_s27 + $0x8] sm:$0xff]  ;;  %v253_v7 = vmul.f32 %v2678_v5, %v2678_v5  ;;  %v234_v10 = vld [vmem:[%s2650_s27 + $0x10] sm:$0xff]  ;;  %v254_v11 = vmul.f32 %v2684_v8, %v2684_v8  ;;  %vm1949_vm6 = vcmask 46080   ;;  %s2161_s23 = sshll.u32 %s2511_s16, 4  ;;  %s229_s4 = scalar_lea.vmem [#allocation7], %s2646_s6 }
  0x53   : > { %2212 = vmatprep.subr.mxu0 %v272_v1  ;;  %2275 = vmatprep.subr.mxu1 %v272_v1  ;;  %v240_v9 = vld [vmem:[%s2657_s9] sm:$0xff]  ;;  %v2691_v12 = vld [vmem:[%s2650_s27 + $0x38] sm:$0xff]  ;;  %v241_v14 = vld [vmem:[%s2657_s9 + $0x8] sm:$0xff]  ;;  %v248_v34 = vmul.f32 %v2673_v3, %v2673_v3  ;;  %v249_v36 = vmul.f32 %v233_v6, %v233_v6  ;;  %v250_v38 = vmul.f32 %v234_v10, %v234_v10  ;;  %vm1984_vm7 = vcmask 1041409   ;;  %s2018_s5 = sshll.u32 %s229_s4, 4  ;;  %s2016_s28 = scalar_lea.hbm %s3605_s3, %s2161_s23  ;;  %s2019_s5 = int_to_ptr.vmem [resolvable:$true] %s2018_s5 }
  0x54   : > { %2213 = vmatpush3.msra.mxu0 %v272_v1  ;;  %2277 = vmatpush3.msra.mxu1 %v272_v1  ;;  %v255_v13 = vmul.f32 %v2691_v12, %v2691_v12  ;;  %v235_v15 = vld [vmem:[%s2650_s27 + $0x18] sm:$0xff]  ;;  %v256_v16 = vmul.f32 %v240_v9, %v240_v9  ;;  %v242_v17 = vld [vmem:[%s2657_s9 + $0x10] sm:$0xff]  ;;  %v257_v18 = vmul.f32 %v241_v14, %v241_v14  ;;  %v244_v21 = vld [vmem:[%s2657_s9 + $0x20] sm:$0xff]  ;;  %vm1986_vm8 = vcmask 1042434   ;;  %s2006_s19 = scalar_lea.sflag [#allocation4], %s2646_s6  ;;  %s2395_s22 = scalar_lea.vmem %s2019_s5, 16 }
  0x55   : > { %2214 = vmatprep.mubr.msk.f32.mxu0 %vm274_vm0, %v2673_v3  ;;  %2244 = vmatprep.mubr.msk.f32.mxu1 %vm274_vm0, %v252_v4  ;;  %v243_v19 = vld [vmem:[%s2657_s9 + $0x18] sm:$0xff]  ;;  %v258_v20 = vmul.f32 %v242_v17, %v242_v17  ;;  %v260_v23 = vmul.f32 %v244_v21, %v244_v21  ;;  %v245_v24 = vld [vmem:[%s2657_s9 + $0x28] sm:$0xff]  ;;  %v246_v25 = vld [vmem:[%s2657_s9 + $0x30] sm:$0xff]  ;;  %v264_v30 = vmul.f32 %v240_v9, %v2673_v3  ;;  %vm1988_vm9 = vcmask 1043459   ;;  %p2396_p13 = scmp.ne.s32.totalorder %s2019_s5, %s2395_s22  ;;  %p3844_p1 = scmp.ne.s32.totalorder %s3645_s24, 0 }
  0x56   : > { %2215 = vmatmul.mubr.msk.f32.vlgmr.msra.gmra.mxu0 %vm274_vm0, %v233_v6  ;;  %2245 = vmatmul.mubr.msk.f32.vlgmr.msra.gmra.mxu1 %vm274_vm0, %v253_v7  ;;  %v259_v22 = vmul.f32 %v243_v19, %v243_v19  ;;  %v261_v26 = vmul.f32 %v245_v24, %v245_v24  ;;  %v262_v27 = vmul.f32 %v246_v25, %v246_v25  ;;  %v247_v28 = vld [vmem:[%s2657_s9 + $0x38] sm:$0xff]  ;;  %vm1991_vm10 = vcmask 44032   ;;  %s2469_s8 = smov [#allocation7]  }
  0x57   : > { %2217 = vmatprep.mubr.msk.f32.mxu0 %vm274_vm0, %v234_v10  ;;  %2247 = vmatprep.mubr.msk.f32.mxu1 %vm274_vm0, %v254_v11  ;;  %v263_v29 = vmul.f32 %v247_v28, %v247_v28  ;;  %v265_v31 = vmul.f32 %v241_v14, %v233_v6  ;;  %v266_v32 = vmul.f32 %v242_v17, %v234_v10  ;;  %vm2003_vm11 = vcmask 24576   ;;  %p2397_p12 = pnand %p2396_p13, %p3844_p1  ;;  %s2399_s30 = sshll.u32 %s2469_s8, 4  ;;  %s2400_s30 = int_to_ptr.vmem [resolvable:$false] %s2399_s30 }
  0x58   : > { %v267_v33 = vmul.f32 %v243_v19, %v235_v15  ;;  %v268_v35 = vmul.f32 %v244_v21, %v2670_v2  ;;  %v269_v37 = vmul.f32 %v245_v24, %v2678_v5  ;;  %v270_v39 = vmul.f32 %v246_v25, %v2684_v8  ;;  %s2401_s16 = scalar_lea.vmem %s2400_s30, 32  ;;  %p2402_p10 = scmp.lt.s32.totalorder %s2019_s5, %s2400_s30 }
  0x59   : > { %v251_v40 = vmul.f32 %v235_v15, %v235_v15  ;;  %v271_v41 = vmul.f32 %v247_v28, %v2691_v12  ;;  %p2398_p7 = pneg %p2397_p12  ;;  %p2403_p0 = scmp.lt.s32.totalorder %s2401_s16, %s2395_s22 }
  0x5a   : > { %2218 = vmatmul.mubr.msk.f32.gmra.mxu0 %vm274_vm0, %v235_v15  ;;  %2248 = vmatmul.mubr.msk.f32.gmra.mxu1 %vm274_vm0, %v255_v13 }
  0x5b   : > { %2220 = vmatprep.mubr.msk.f32.mxu0 %vm274_vm0, %v2670_v2  ;;  %2250 = vmatprep.mubr.msk.f32.mxu1 %vm274_vm0, %v256_v16  ;;  %p2404_p2 = por %p2403_p0, %p2402_p10 }
  0x5d   : > { %p2405_p4 = pnand %p2404_p2, %p2398_p7 }
  0x5e   : > { %2221 = vmatmul.mubr.msk.f32.gmra.mxu0 %vm274_vm0, %v2678_v5  ;;  %2251 = vmatmul.mubr.msk.f32.gmra.mxu1 %vm274_vm0, %v257_v18 }
  0x5f   : > { %2223 = vmatprep.mubr.msk.f32.mxu0 %vm274_vm0, %v2684_v8  ;;  %2253 = vmatprep.mubr.msk.f32.mxu1 %vm274_vm0, %v258_v20 }
  0x62   : > { %2224 = vmatmul.mubr.msk.f32.gmra.mxu0 %vm274_vm0, %v2691_v12  ;;  %2254 = vmatmul.mubr.msk.f32.gmra.mxu1 %vm274_vm0, %v259_v22 }
  0x63   : > { %2226 = vmatprep.mubr.msk.f32.mxu0 %vm274_vm0, %v240_v9  ;;  %2256 = vmatprep.mubr.msk.f32.mxu1 %vm274_vm0, %v260_v23 }
  0x66   : > { %2227 = vmatmul.mubr.msk.f32.gmra.mxu0 %vm274_vm0, %v241_v14  ;;  %2257 = vmatmul.mubr.msk.f32.gmra.mxu1 %vm274_vm0, %v261_v26 }
  0x67   : > { %2229 = vmatprep.mubr.msk.f32.mxu0 %vm274_vm0, %v242_v17  ;;  %2259 = vmatprep.mubr.msk.f32.mxu1 %vm274_vm0, %v262_v27 }
  0x6a   : > { %2230 = vmatmul.mubr.msk.f32.gmra.mxu0 %vm274_vm0, %v243_v19  ;;  %2260 = vmatmul.mubr.msk.f32.gmra.mxu1 %vm274_vm0, %v263_v29 }
  0x6b   : > { %2232 = vmatprep.mubr.msk.f32.mxu0 %vm274_vm0, %v244_v21  ;;  %2262 = vmatprep.mubr.msk.f32.mxu1 %vm274_vm0, %v264_v30 }
  0x6e   : > { %2233 = vmatmul.mubr.msk.f32.gmra.mxu0 %vm274_vm0, %v245_v24  ;;  %2263 = vmatmul.mubr.msk.f32.gmra.mxu1 %vm274_vm0, %v265_v31 }
  0x6f   : > { %2235 = vmatprep.mubr.msk.f32.mxu0 %vm274_vm0, %v246_v25  ;;  %2265 = vmatprep.mubr.msk.f32.mxu1 %vm274_vm0, %v266_v32 }
  0x72   : > { %2236 = vmatmul.mubr.msk.f32.gmra.mxu0 %vm274_vm0, %v247_v28  ;;  %2266 = vmatmul.mubr.msk.f32.gmra.mxu1 %vm274_vm0, %v267_v33 }
  0x73   : > { %2238 = vmatprep.mubr.msk.f32.mxu0 %vm274_vm0, %v248_v34  ;;  %2268 = vmatprep.mubr.msk.f32.mxu1 %vm274_vm0, %v268_v35 }
  0x76   : > { %2239 = vmatmul.mubr.msk.f32.gmra.mxu0 %vm274_vm0, %v249_v36  ;;  %2269 = vmatmul.mubr.msk.f32.gmra.mxu1 %vm274_vm0, %v269_v37 }
  0x77   : > { %2241 = vmatprep.mubr.msk.f32.mxu0 %vm274_vm0, %v250_v38  ;;  %2271 = vmatprep.mubr.msk.f32.mxu1 %vm274_vm0, %v270_v39 }
  0x7a   : > { %2242 = vmatmul.mubr.msk.f32.gmra.mxu0 %vm274_vm0, %v251_v40  ;;  %2272 = vmatmul.mubr.msk.f32.gmra.mxu1 %vm274_vm0, %v271_v41 }
 0x116   : > { %v2216_v42 = vpop.f32.mrf.mxu0  ;;  %v2246_v45 = vpop.f32.mrf.mxu1 }
 0x117   : > { %v2755_v43 = vmul.f32 0.10936069, %v2216_v42  ;;  %v2757_v44 = vmul.f32 0.21300554, %v2216_v42  ;;  %v2759_v47 = vmul.f32 0.26601171, %v2216_v42 }
 0x118   : > { %v461_v46 = vpop.f32.mrf.mxu0  ;;  %v2761_v48 = vmul.f32 0.007598758, %v2216_v42  ;;  %v2763_v49 = vmul.f32 0.036000773, %v2216_v42  ;;  %v2765_v50 = vmul.f32 0.0010283801, %v2216_v42  ;;  %v561_v56 = vpop.f32.mrf.mxu1 }
 0x119   : > { %3650 = vst [vmem:[#allocation11_spill] sm:$0xff] %v2755_v43  ;;  %v680_v51 = vmul.f32 0.007598758, %v461_v46  ;;  %v962_v52 = vrot.slane %v2755_v43, 3  ;;  %v1143_v53 = vrot.slane %v2757_v44, 4  ;;  %v1324_v57 = vrot.slane %v2759_v47, 5 }
 0x11a   : > { %3651 = vst [vmem:[#allocation12_spill] sm:$0xff] %v2761_v48  ;;  %3652 = vst [vmem:[#allocation13_spill] sm:$0xff] %v2763_v49  ;;  %v2769_v54 = vmul.f32 0.10936069, %v2246_v45  ;;  %v780_v55 = vmul.f32 0.036000773, %v461_v46  ;;  %v2219_v25 = vpop.f32.mrf.mxu0 }
 0x11b   : > { %3653 = vst [vmem:[#allocation14_spill] sm:$0xff] %v2765_v50  ;;  %v660_v58 = vmul.f32 0.0010283801, %v461_v46  ;;  %v720_v59 = vrot.slane %v680_v51, 1  ;;  %v2772_v60 = vmul.f32 0.10936069, %v461_v46 }
 0x11c   : > { %v1425_v61 = vrot.slane %v2757_v44, 6  ;;  %v1082_v0 = vmul.f32 0.21300554, %v2246_v45  ;;  %v670_v2 = vmul.f32 0.0010283801, %v561_v56  ;;  %v992_v5 = vrot.slane %v2769_v54, 3 }
 0x11d   : > { %3654 = vst [vmem:[#allocation15_spill] sm:$0xff] %v2772_v60  ;;  %v760_v1 = vadd.f32 %v720_v59, %v660_v58  ;;  %v690_v3 = vmul.f32 0.007598758, %v561_v56  ;;  %v790_v4 = vmul.f32 0.036000773, %v561_v56  ;;  %v820_v6 = vrot.slane %v780_v55, 2  ;;  %v2249_v55 = vpop.f32.mrf.mxu1 }
 0x11e   : > { %v1061_v7 = vmul.f32 0.21300554, %v461_v46  ;;  %v900_v8 = vmul.f32 0.10936069, %v561_v56  ;;  %v961_v9 = vrot.slane %v2772_v60, 3  ;;  %v1173_v17 = vrot.slane %v1082_v0, 4 }
 0x11f   : > { %v730_v10 = vrot.slane %v690_v3, 1  ;;  %v830_v11 = vrot.slane %v790_v4, 2  ;;  %v1081_v12 = vmul.f32 0.21300554, %v561_v56  ;;  %v1263_v13 = vmul.f32 0.26601171, %v2246_v45 }
 0x120   : > { %v860_v14 = vadd.f32 %v820_v6, %v760_v1  ;;  %v1242_v15 = vmul.f32 0.26601171, %v461_v46  ;;  %v991_v16 = vrot.slane %v900_v8, 3  ;;  %v2779_v18 = vmul.f32 0.036000773, %v2246_v45 }
 0x121   : > { %v2781_v19 = vmul.f32 0.007598758, %v2246_v45  ;;  %v770_v20 = vadd.f32 %v730_v10, %v670_v2  ;;  %v1455_v21 = vrot.slane %v1082_v0, 6  ;;  %v1172_v23 = vrot.slane %v1081_v12, 4 }
 0x122   : > { %v993_v22 = vsel %vm960_vm1, %v991_v16, %v992_v5  ;;  %v1262_v24 = vmul.f32 0.26601171, %v561_v56  ;;  %v2784_v26 = vmul.f32 0.0010283801, %v2246_v45  ;;  %v963_v27 = vsel %vm960_vm1, %v961_v9, %v962_v52  ;;  %v471_v56 = vpop.f32.mrf.mxu0 }
 0x123   : > { %v1142_v28 = vrot.slane %v1061_v7, 4  ;;  %v870_v29 = vadd.f32 %v830_v11, %v770_v20  ;;  %v1556_v30 = vrot.slane %v2769_v54, 7  ;;  %v1041_v31 = vadd.f32 %v963_v27, %v860_v14  ;;  %v571_v11 = vpop.f32.mrf.mxu1 }
 0x124   : > { %v1323_v32 = vrot.slane %v1242_v15, 5  ;;  %v1424_v33 = vrot.slane %v1061_v7, 6  ;;  %v1454_v35 = vrot.slane %v1081_v12, 6  ;;  %v1555_v36 = vrot.slane %v900_v8, 7 }
 0x125   : > { %v1051_v34 = vadd.f32 %v993_v22, %v870_v29  ;;  %v2788_v37 = vmul.f32 0.10936069, %v2219_v25  ;;  %v1354_v38 = vrot.slane %v1263_v13, 5  ;;  %v1715_v39 = vrot.slane %v2781_v19, 1 }
 0x126   : > { %v1174_v40 = vsel %vm1141_vm2, %v1172_v23, %v1173_v17  ;;  %v1353_v41 = vrot.slane %v1262_v24, 5  ;;  %v1144_v44 = vsel %vm1141_vm2, %v1142_v28, %v1143_v53  ;;  %v2794_v45 = vmul.f32 0.21300554, %v2219_v25 }
 0x127   : > { %3655 = vst [vmem:[#allocation16_spill] sm:$0xff] %v2788_v37  ;;  %v2796_v46 = vmul.f32 0.26601171, %v2219_v25  ;;  %v1222_v47 = vadd.f32 %v1144_v44, %v1041_v31  ;;  %v1325_v51 = vsel %vm1322_vm3, %v1323_v32, %v1324_v57  ;;  %v2800_v52 = vsel %vm1423_vm4, %v1424_v33, %v1425_v61 }
 0x128   : > { %3656 = vst [vmem:[#allocation17_spill] sm:$0xff] %v2800_v52  ;;  %v1232_v58 = vadd.f32 %v1174_v40, %v1051_v34  ;;  %v1456_v59 = vsel %vm1423_vm4, %v1454_v35, %v1455_v21  ;;  %v1557_v0 = vsel %vm1524_vm5, %v1555_v36, %v1556_v30  ;;  %v965_v53 = vrot.slane %v2788_v37, 3 }
 0x129   : > { %v1355_v1 = vsel %vm1322_vm3, %v1353_v41, %v1354_v38  ;;  %v2808_v3 = vmul.f32 0.036000773, %v2219_v25  ;;  %v2810_v57 = vmul.f32 0.007598758, %v2219_v25  ;;  %v1146_v61 = vrot.slane %v2794_v45, 4 }
 0x12a   : > { %v1327_v4 = vrot.slane %v2796_v46, 5  ;;  %v681_v5 = vmul.f32 0.007598758, %v471_v56  ;;  %v781_v6 = vmul.f32 0.036000773, %v471_v56  ;;  %v2814_v7 = vadd.f32 %v1325_v51, %v1222_v47 }
 0x12b   : > { %3657 = vst [vmem:[#allocation18_spill] sm:$0xff] %v2808_v3  ;;  %3658 = vst [vmem:[#allocation19_spill] sm:$0xff] %v2810_v57  ;;  %v2816_v8 = vmul.f32 0.0010283801, %v2219_v25  ;;  %v2818_v9 = vmul.f32 0.10936069, %v2249_v55  ;;  %v1413_v12 = vadd.f32 %v1355_v1, %v1232_v58 }
 0x12c   : > { %3659 = vst [vmem:[#allocation20_spill] sm:$0xff] %v2814_v7  ;;  %v2820_v10 = vmul.f32 0.10936069, %v471_v56  ;;  %v1428_v13 = vrot.slane %v2794_v45, 6  ;;  %v661_v14 = vmul.f32 0.0010283801, %v471_v56 }
 0x12d   : > { %3660 = vst [vmem:[#allocation21_spill] sm:$0xff] %v2816_v8  ;;  %v721_v15 = vrot.slane %v681_v5, 1  ;;  %v1084_v17 = vmul.f32 0.21300554, %v2249_v55  ;;  %v821_v20 = vrot.slane %v781_v6, 2  ;;  %v995_v28 = vrot.slane %v2818_v9, 3 }
 0x12e   : > { %3661 = vst [vmem:[#allocation22_spill] sm:$0xff] %v2820_v10  ;;  %v1063_v21 = vmul.f32 0.21300554, %v471_v56  ;;  %v964_v23 = vrot.slane %v2820_v10, 3  ;;  %v671_v24 = vmul.f32 0.0010283801, %v571_v11  ;;  %v1514_v31 = vadd.f32 %v1456_v59, %v1413_v12 }
 0x12f   : > { %v761_v22 = vadd.f32 %v721_v15, %v661_v14  ;;  %v691_v25 = vmul.f32 0.007598758, %v571_v11  ;;  %v1265_v29 = vmul.f32 0.26601171, %v2249_v55  ;;  %v791_v30 = vmul.f32 0.036000773, %v571_v11 }
 0x130   : > { %v902_v34 = vmul.f32 0.10936069, %v571_v11  ;;  %v1145_v35 = vrot.slane %v1063_v21, 4  ;;  %v1244_v36 = vmul.f32 0.26601171, %v471_v56  ;;  %v966_v41 = vsel %vm960_vm1, %v964_v23, %v965_v53  ;;  %v2222_v56 = vpop.f32.mrf.mxu0 }
 0x131   : > { %v861_v32 = vadd.f32 %v821_v20, %v761_v22  ;;  %v731_v33 = vrot.slane %v691_v25, 1  ;;  %v831_v38 = vrot.slane %v791_v30, 2  ;;  %v1083_v40 = vmul.f32 0.21300554, %v571_v11 }
 0x132   : > { %v994_v45 = vrot.slane %v902_v34, 3  ;;  %v1264_v47 = vmul.f32 0.26601171, %v571_v11  ;;  %v1176_v51 = vrot.slane %v1084_v17, 4  ;;  %v1357_v58 = vrot.slane %v1265_v29, 5 }
 0x133   : > { %v771_v44 = vadd.f32 %v731_v33, %v671_v24  ;;  %v2828_v1 = vmul.f32 0.036000773, %v2249_v55  ;;  %v1042_v5 = vadd.f32 %v966_v41, %v861_v32  ;;  %v1559_v6 = vrot.slane %v2818_v9, 7 }
 0x134   : > { %v2831_v59 = vmul.f32 0.007598758, %v2249_v55  ;;  %v2833_v12 = vmul.f32 0.0010283801, %v2249_v55  ;;  %v1615_v15 = vadd.f32 %v1557_v0, %v1514_v31  ;;  %v1427_v20 = vrot.slane %v1063_v21, 6 }
 0x135   : > { %v871_v14 = vadd.f32 %v831_v38, %v771_v44  ;;  %v996_v53 = vsel %vm960_vm1, %v994_v45, %v995_v28  ;;  %v1175_v22 = vrot.slane %v1083_v40, 4  ;;  %v1147_v11 = vsel %vm1141_vm2, %v1145_v35, %v1146_v61 }
 0x136   : > { %3662 = vst [vmem:[#allocation23_spill] sm:$0xff] %v2833_v12  ;;  %v1326_v23 = vrot.slane %v1244_v36, 5  ;;  %v1356_v24 = vrot.slane %v1264_v47, 5  ;;  %v1558_v25 = vrot.slane %v902_v34, 7  ;;  %v1458_v29 = vrot.slane %v1084_v17, 6  ;;  %v2252_v36 = vpop.f32.mrf.mxu1 }
 0x137   : > { %v1223_v30 = vadd.f32 %v1147_v11, %v1042_v5  ;;  %v1457_v32 = vrot.slane %v1083_v40, 6  ;;  %v2837_v9 = vmul.f32 0.10936069, %v2222_v56  ;;  %v1052_v38 = vadd.f32 %v996_v53, %v871_v14  ;;  %v481_v40 = vpop.f32.mrf.mxu0 }
 0x138   : > { %v2841_v0 = vmul.f32 0.21300554, %v2222_v56  ;;  %v2844_v21 = vsel %vm1423_vm4, %v1427_v20, %v1428_v13  ;;  %v1177_v28 = vsel %vm1141_vm2, %v1175_v22, %v1176_v51  ;;  %v2848_v31 = vmul.f32 0.26601171, %v2222_v56  ;;  %v581_v22 = vpop.f32.mrf.mxu1 }
 0x139   : > { %3663 = vst [vmem:[#allocation24_spill] sm:$0xff] %v2844_v21  ;;  %v1328_v17 = vsel %vm1322_vm3, %v1326_v23, %v1327_v4  ;;  %v1358_v34 = vsel %vm1322_vm3, %v1356_v24, %v1357_v58  ;;  %v2855_v35 = vsel %vm1524_vm5, %v1558_v25, %v1559_v6  ;;  %v1655_v13 = vadd.f32 %v2779_v18, %v1615_v15 }
 0x13a   : > { %v2858_v41 = vadd.f32 %v1328_v17, %v1223_v30  ;;  %v1459_v44 = vsel %vm1423_vm4, %v1457_v32, %v1458_v29  ;;  %v968_v45 = vrot.slane %v2837_v9, 3  ;;  %v2862_v47 = vmul.f32 0.007598758, %v2222_v56 }
 0x13b   : > { %v1233_v46 = vadd.f32 %v1177_v28, %v1052_v38  ;;  %v1149_v4 = vrot.slane %v2841_v0, 4  ;;  %v2866_v58 = vmul.f32 0.036000773, %v2222_v56  ;;  %v1330_v5 = vrot.slane %v2848_v31, 5 }
 0x13c   : > { %3664 = vst [vmem:[#allocation25_spill] sm:$0xff] %v2858_v41  ;;  %v2870_v18 = vmul.f32 0.0010283801, %v2222_v56  ;;  %v682_v14 = vmul.f32 0.007598758, %v481_v40  ;;  %v2878_v11 = vadd.f32 %v1715_v39, %v1655_v13 }
 0x13d   : > { %v2872_v15 = vmul.f32 0.10936069, %v2252_v36  ;;  %v782_v20 = vmul.f32 0.036000773, %v481_v40  ;;  %v2874_v53 = vmul.f32 0.10936069, %v481_v40  ;;  %v1414_v30 = vadd.f32 %v1358_v34, %v1233_v46 }
 0x13e   : > { %v2881_v24 = vmul.f32 0.21300554, %v2252_v36  ;;  %v662_v25 = vmul.f32 0.0010283801, %v481_v40  ;;  %v722_v29 = vrot.slane %v682_v14, 1 }
 0x13f   : > { %v1267_v56 = vmul.f32 0.26601171, %v2252_v36  ;;  %v967_v32 = vrot.slane %v2874_v53, 3  ;;  %v1065_v38 = vmul.f32 0.21300554, %v481_v40  ;;  %v822_v17 = vrot.slane %v782_v20, 2 }
 0x140   : > { %v762_v28 = vadd.f32 %v722_v29, %v662_v25  ;;  %v672_v27 = vmul.f32 0.0010283801, %v581_v22  ;;  %v692_v16 = vmul.f32 0.007598758, %v581_v22  ;;  %v998_v61 = vrot.slane %v2872_v15, 3 }
 0x141   : > { %v1562_v19 = vrot.slane %v2872_v15, 7  ;;  %v2886_v39 = vmul.f32 0.036000773, %v2252_v36  ;;  %v792_v13 = vmul.f32 0.036000773, %v581_v22  ;;  %v969_v34 = vsel %vm960_vm1, %v967_v32, %v968_v45  ;;  %v2225_v45 = vpop.f32.mrf.mxu0 }
 0x142   : > { %v862_v2 = vadd.f32 %v822_v17, %v762_v28  ;;  %v1246_v63 = vmul.f32 0.26601171, %v481_v40  ;;  %v732_v54 = vrot.slane %v692_v16, 1  ;;  %v904_v14 = vmul.f32 0.10936069, %v581_v22 }
 0x143   : > { %3665 = vst [vmem:[#allocation26_spill] sm:$0xff] %v2886_v39  ;;  %v1148_v46 = vrot.slane %v1065_v38, 4  ;;  %v832_v62 = vrot.slane %v792_v13, 2  ;;  %v1085_v33 = vmul.f32 0.21300554, %v581_v22  ;;  %v1515_v23 = vadd.f32 %v1459_v44, %v1414_v30 }
 0x144   : > { %v2889_v25 = vmul.f32 0.007598758, %v2252_v36  ;;  %v1043_v20 = vadd.f32 %v969_v34, %v862_v2  ;;  %v772_v29 = vadd.f32 %v732_v54, %v672_v27  ;;  %v997_v55 = vrot.slane %v904_v14, 3 }
 0x145   : > { %v1179_v15 = vrot.slane %v2881_v24, 4  ;;  %v2892_v42 = vmul.f32 0.0010283801, %v2252_v36  ;;  %v1266_v51 = vmul.f32 0.26601171, %v581_v22  ;;  %v1360_v28 = vrot.slane %v1267_v56, 5 }
 0x146   : > { %3666 = vst [vmem:[#allocation27_spill] sm:$0xff] %v2889_v25  ;;  %v872_v40 = vadd.f32 %v832_v62, %v772_v29  ;;  %v999_v16 = vsel %vm960_vm1, %v997_v55, %v998_v61  ;;  %v1178_v17 = vrot.slane %v1085_v33, 4  ;;  %v1461_v32 = vrot.slane %v2881_v24, 6  ;;  %v491_v29 = vpop.f32.mrf.mxu0 }
 0x147   : > { %3667 = vst [vmem:[#allocation28_spill] sm:$0xff] %v2892_v42  ;;  %v1150_v13 = vsel %vm1141_vm2, %v1148_v46, %v1149_v4  ;;  %v1329_v6 = vrot.slane %v1246_v63, 5  ;;  %v1430_v2 = vrot.slane %v1065_v38, 6  ;;  %v1531_v44 = vrot.slane %v2874_v53, 7 }
 0x148   : > { %v1224_v27 = vadd.f32 %v1150_v13, %v1043_v20  ;;  %v1561_v36 = vrot.slane %v904_v14, 7  ;;  %v1053_v30 = vadd.f32 %v999_v16, %v872_v40  ;;  %v1359_v22 = vrot.slane %v1266_v51, 5  ;;  %v2255_v20 = vpop.f32.mrf.mxu1 }
 0x149   : > { %v1460_v56 = vrot.slane %v1085_v33, 6  ;;  %v2899_v62 = vmul.f32 0.10936069, %v2225_v45  ;;  %v2902_v55 = vadd.f32 %v2855_v35, %v1515_v23  ;;  %v1180_v4 = vsel %vm1141_vm2, %v1178_v17, %v1179_v15 }
 0x14a   : > { %v1331_v24 = vsel %vm1322_vm3, %v1329_v6, %v1330_v5  ;;  %v3668_v53 = vrot.slane %v2841_v0, 6  ;;  %v2913_v33 = vmul.f32 0.21300554, %v2225_v45  ;;  %v2915_v38 = vmul.f32 0.26601171, %v2225_v45 }
 0x14b   : > { %v1405_v35 = vadd.f32 %v1331_v24, %v1224_v27  ;;  %v2918_v23 = vsel %vm1524_vm5, %v1561_v36, %v1562_v19  ;;  %v2920_v14 = vmul.f32 0.007598758, %v2225_v45  ;;  %v3669_v34 = vrot.slane %v2837_v9, 7 }
 0x14c   : > { %v1432_v51 = vsel %vm1423_vm4, %v1430_v2, %v3668_v53  ;;  %v1234_v46 = vadd.f32 %v1180_v4, %v1053_v30  ;;  %v1361_v5 = vsel %vm1322_vm3, %v1359_v22, %v1360_v28  ;;  %v1462_v0 = vsel %vm1423_vm4, %v1460_v56, %v1461_v32  ;;  %v591_v22 = vpop.f32.mrf.mxu1 }
 0x14d   : > { %v1533_v31 = vsel %vm1524_vm5, %v1531_v44, %v3669_v34  ;;  %v971_v6 = vrot.slane %v2899_v62, 3  ;;  %v2929_v40 = vmul.f32 0.036000773, %v2225_v45  ;;  %v2931_v19 = vmul.f32 0.0010283801, %v2225_v45 }
 0x14e   : > { %v3670_v9 = vrot.slane %v2784_v26, 2  ;;  %v2941_v13 = vmul.f32 0.10936069, %v2255_v20  ;;  %v2944_v27 = vmul.f32 0.21300554, %v2255_v20  ;;  %v1506_v45 = vadd.f32 %v1432_v51, %v1405_v35 }
 0x14f   : > { %v683_v44 = vmul.f32 0.007598758, %v491_v29  ;;  %v1415_v36 = vadd.f32 %v1361_v5, %v1234_v46  ;;  %v2946_v30 = vmul.f32 0.26601171, %v2255_v20  ;;  %v783_v26 = vmul.f32 0.036000773, %v491_v29 }
 0x150   : > { %v2936_v16 = vadd.f32 %v3670_v9, %v2878_v11  ;;  %v2948_v11 = vmul.f32 0.10936069, %v491_v29  ;;  %v2951_v4 = vmul.f32 0.036000773, %v2255_v20  ;;  %v663_v24 = vmul.f32 0.0010283801, %v491_v29 }
 0x151   : > { %v723_v53 = vrot.slane %v683_v44, 1  ;;  %v1001_v34 = vrot.slane %v2941_v13, 3  ;;  %v1565_v9 = vrot.slane %v2941_v13, 7  ;;  %v2955_v61 = vmul.f32 0.007598758, %v2255_v20 }
 0x152   : > { %3671 = vst [vmem:[#allocation29_spill] sm:$0xff] %v2951_v4  ;;  %v1067_v51 = vmul.f32 0.21300554, %v491_v29  ;;  %v673_v46 = vmul.f32 0.0010283801, %v591_v22  ;;  %v823_v2 = vrot.slane %v783_v26, 2  ;;  %v1516_v32 = vadd.f32 %v1462_v0, %v1415_v36  ;;  %v2228_v26 = vpop.f32.mrf.mxu0 }
 0x153   : > { %3672 = vst [vmem:[#allocation30_spill] sm:$0xff] %v2955_v61  ;;  %v763_v35 = vadd.f32 %v723_v53, %v663_v24  ;;  %v693_v5 = vmul.f32 0.007598758, %v591_v22  ;;  %v793_v54 = vmul.f32 0.036000773, %v591_v22  ;;  %v970_v15 = vrot.slane %v2948_v11, 3 }
 0x154   : > { %v1248_v63 = vmul.f32 0.26601171, %v491_v29  ;;  %v906_v56 = vmul.f32 0.10936069, %v591_v22  ;;  %v1087_v44 = vmul.f32 0.21300554, %v591_v22  ;;  %v1607_v42 = vadd.f32 %v1533_v31, %v1506_v45 }
 0x155   : > { %v733_v28 = vrot.slane %v693_v5, 1  ;;  %v833_v17 = vrot.slane %v793_v54, 2  ;;  %v1182_v8 = vrot.slane %v2944_v27, 4  ;;  %v1363_v13 = vrot.slane %v2946_v30, 5 }
 0x156   : > { %v863_v57 = vadd.f32 %v823_v2, %v763_v35  ;;  %v1000_v3 = vrot.slane %v906_v56, 3  ;;  %v1464_v24 = vrot.slane %v2944_v27, 6  ;;  %v2961_v53 = vmul.f32 0.0010283801, %v2255_v20 }
 0x157   : > { %v773_v4 = vadd.f32 %v733_v28, %v673_v46  ;;  %v972_v0 = vsel %vm960_vm1, %v970_v15, %v971_v6  ;;  %v1151_v36 = vrot.slane %v1067_v51, 4  ;;  %v1332_v54 = vrot.slane %v1248_v63, 5  ;;  %v501_v46 = vpop.f32.mrf.mxu0 }
 0x158   : > { %3673 = vst [vmem:[#allocation31_spill] sm:$0xff] %v2961_v53  ;;  %v1002_v10 = vsel %vm960_vm1, %v1000_v3, %v1001_v34  ;;  %v1181_v37 = vrot.slane %v1087_v44, 4  ;;  %v1268_v30 = vmul.f32 0.26601171, %v591_v22  ;;  %v1044_v2 = vadd.f32 %v972_v0, %v863_v57 }
 0x159   : > { %v873_v5 = vadd.f32 %v833_v17, %v773_v4  ;;  %v1433_v35 = vrot.slane %v1067_v51, 6  ;;  %v1564_v21 = vrot.slane %v906_v56, 7  ;;  %v2966_v27 = vmul.f32 0.10936069, %v2228_v26  ;;  %v2258_v51 = vpop.f32.mrf.mxu1  ;;  %v2231_v48 = vpop.f32.mrf.mxu0 }
 0x15a   : > { %v2969_v20 = vadd.f32 %v2918_v23, %v1516_v32  ;;  %v1463_v28 = vrot.slane %v1087_v44, 6  ;;  %v1647_v6 = vadd.f32 %v2866_v58, %v1607_v42  ;;  %v2974_v17 = vmul.f32 0.21300554, %v2228_v26 }
 0x15b   : > { %3674 = vst [vmem:[#allocation32_spill] sm:$0xff] %v2966_v27  ;;  %v1054_v15 = vadd.f32 %v1002_v10, %v873_v5  ;;  %v2976_v3 = vmul.f32 0.26601171, %v2228_v26  ;;  %v3676_v57 = vrot.slane %v2913_v33, 4  ;;  %v3677_v22 = vrot.slane %v2915_v38, 5 }
 0x15c   : > { %3675 = vst [vmem:[#allocation33_spill] sm:$0xff] %v2969_v20  ;;  %v1183_v32 = vsel %vm1141_vm2, %v1181_v37, %v1182_v8  ;;  %v1362_v56 = vrot.slane %v1268_v30, 5  ;;  %v3678_v42 = vrot.slane %v2913_v33, 6  ;;  %v2991_v58 = vsel %vm1524_vm5, %v1564_v21, %v1565_v9 }
 0x15d   : > { %v1153_v45 = vsel %vm1141_vm2, %v1151_v36, %v3676_v57  ;;  %v1334_v23 = vsel %vm1322_vm3, %v1332_v54, %v3677_v22  ;;  %v974_v34 = vrot.slane %v2966_v27, 3  ;;  %v1465_v38 = vsel %vm1423_vm4, %v1463_v28, %v1464_v24 }
 0x15e   : > { %v1225_v4 = vadd.f32 %v1153_v45, %v1044_v2  ;;  %v2988_v10 = vsel %vm1423_vm4, %v1433_v35, %v3678_v42  ;;  %v2996_v0 = vmul.f32 0.036000773, %v2228_v26  ;;  %v2998_v37 = vmul.f32 0.007598758, %v2228_v26 }
 0x15f   : > { %v1235_v8 = vadd.f32 %v1183_v32, %v1054_v15  ;;  %v1364_v9 = vsel %vm1322_vm3, %v1362_v56, %v1363_v13  ;;  %v3004_v54 = vmul.f32 0.0010283801, %v2228_v26  ;;  %v3006_v5 = vmul.f32 0.10936069, %v2258_v51  ;;  %v601_v15 = vpop.f32.mrf.mxu1 }
 0x160   : > { %3679 = vst [vmem:[#allocation34_spill] sm:$0xff] %v2996_v0  ;;  %3680 = vst [vmem:[#allocation35_spill] sm:$0xff] %v2998_v37  ;;  %v684_v24 = vmul.f32 0.007598758, %v501_v46  ;;  %v3008_v30 = vadd.f32 %v1334_v23, %v1225_v4  ;;  %v3010_v2 = vmul.f32 0.21300554, %v2258_v51 }
 0x161   : > { %3681 = vst [vmem:[#allocation36_spill] sm:$0xff] %v3004_v54  ;;  %v3012_v35 = vmul.f32 0.26601171, %v2258_v51  ;;  %v3014_v28 = vmul.f32 0.036000773, %v2258_v51  ;;  %v1416_v13 = vadd.f32 %v1364_v9, %v1235_v8  ;;  %v3683_v23 = vrot.slane %v2862_v47, 1 }
 0x162   : > { %v664_v45 = vmul.f32 0.0010283801, %v501_v46  ;;  %v724_v22 = vrot.slane %v684_v24, 1  ;;  %v784_v32 = vmul.f32 0.036000773, %v501_v46  ;;  %v1004_v42 = vrot.slane %v3006_v5, 3 }
 0x163   : > { %v3017_v26 = vmul.f32 0.007598758, %v2258_v51  ;;  %v3019_v56 = vmul.f32 0.10936069, %v501_v46  ;;  %v1747_v4 = vadd.f32 %v3683_v23, %v1647_v6  ;;  %v674_v29 = vmul.f32 0.0010283801, %v601_v15 }
 0x164   : > { %v764_v31 = vadd.f32 %v724_v22, %v664_v45  ;;  %v694_v44 = vmul.f32 0.007598758, %v601_v15  ;;  %v1185_v63 = vrot.slane %v3010_v2, 4  ;;  %v1366_v57 = vrot.slane %v3012_v35, 5 }
 0x165   : > { %3682 = vst [vmem:[#allocation37_spill] sm:$0xff] %v3019_v56  ;;  %v1467_v24 = vrot.slane %v3010_v2, 6  ;;  %v794_v36 = vmul.f32 0.036000773, %v601_v15  ;;  %v824_v8 = vrot.slane %v784_v32, 2  ;;  %v973_v53 = vrot.slane %v3019_v56, 3 }
 0x166   : > { %v1069_v9 = vmul.f32 0.21300554, %v501_v46  ;;  %v734_v21 = vrot.slane %v694_v44, 1  ;;  %v908_v33 = vmul.f32 0.10936069, %v601_v15  ;;  %v1568_v54 = vrot.slane %v3006_v5, 7 }
 0x167   : > { %v1250_v47 = vmul.f32 0.26601171, %v501_v46  ;;  %v834_v6 = vrot.slane %v794_v36, 2  ;;  %v1089_v23 = vmul.f32 0.21300554, %v601_v15  ;;  %v864_v61 = vadd.f32 %v824_v8, %v764_v31 }
 0x168   : > { %v774_v45 = vadd.f32 %v734_v21, %v674_v29  ;;  %v1003_v22 = vrot.slane %v908_v33, 3  ;;  %v1270_v41 = vmul.f32 0.26601171, %v601_v15  ;;  %v3030_v25 = vmul.f32 0.0010283801, %v2258_v51 }
 0x169   : > { %v1184_v2 = vrot.slane %v1089_v23, 4  ;;  %v1517_v32 = vadd.f32 %v1465_v38, %v1416_v13  ;;  %v1154_v50 = vrot.slane %v1069_v9, 4  ;;  %v975_v46 = vsel %vm960_vm1, %v973_v53, %v974_v34 }
 0x16a   : > { %v874_v44 = vadd.f32 %v834_v6, %v774_v45  ;;  %v1005_v37 = vsel %vm960_vm1, %v1003_v22, %v1004_v42  ;;  %v1335_v36 = vrot.slane %v1250_v47, 5  ;;  %v1436_v31 = vrot.slane %v1069_v9, 6 }
 0x16b   : > { %v3684_v29 = vrot.slane %v2870_v18, 2  ;;  %v1045_v5 = vadd.f32 %v975_v46, %v864_v61  ;;  %v1186_v51 = vsel %vm1141_vm2, %v1184_v2, %v1185_v63  ;;  %v1365_v8 = vrot.slane %v1270_v41, 5  ;;  %v511_v46 = vpop.f32.mrf.mxu0 }
 0x16c   : > { %v1055_v15 = vadd.f32 %v1005_v37, %v874_v44  ;;  %v1466_v13 = vrot.slane %v1089_v23, 6  ;;  %v1567_v6 = vrot.slane %v908_v33, 7  ;;  %v3040_v45 = vmul.f32 0.10936069, %v2231_v48  ;;  %v2261_v44 = vpop.f32.mrf.mxu1 }
 0x16d   : > { %v3036_v21 = vadd.f32 %v3684_v29, %v1747_v4  ;;  %v3043_v42 = vadd.f32 %v2991_v58, %v1517_v32  ;;  %v3688_v53 = vrot.slane %v2974_v17, 4  ;;  %v3049_v61 = vmul.f32 0.21300554, %v2231_v48  ;;  %v2234_v49 = vpop.f32.mrf.mxu0 }
 0x16e   : > { %3686 = vst [vmem:[#allocation39_spill] sm:$0xff] %v3040_v45  ;;  %v3689_v63 = vrot.slane %v2974_v17, 6  ;;  %v1236_v37 = vadd.f32 %v1186_v51, %v1055_v15  ;;  %v3056_v33 = vmul.f32 0.26601171, %v2231_v48  ;;  %v3058_v4 = vmul.f32 0.007598758, %v2231_v48 }
 0x16f   : > { %3685 = vst [vmem:[#allocation38_spill] sm:$0xff] %v3036_v21  ;;  %3687 = vst [vmem:[#allocation40_spill] sm:$0xff] %v3043_v42  ;;  %v1156_v18 = vsel %vm1141_vm2, %v1154_v50, %v3688_v53  ;;  %v3692_v9 = vrot.slane %v2976_v3, 5  ;;  %v1367_v50 = vsel %vm1322_vm3, %v1365_v8, %v1366_v57  ;;  %v3066_v23 = vmul.f32 %v3036_v21, %v3036_v21 }
 0x170   : > { %v3054_v41 = vsel %vm1423_vm4, %v1436_v31, %v3689_v63  ;;  %3691 = vst [vmem:[#allocation42_spill] sm:$0xff] %v3058_v4  ;;  %v1226_v58 = vadd.f32 %v1156_v18, %v1045_v5  ;;  %v1468_v17 = vsel %vm1423_vm4, %v1466_v13, %v1467_v24  ;;  %v3070_v22 = vsel %vm1524_vm5, %v1567_v6, %v1568_v54  ;;  %v611_v18 = vpop.f32.mrf.mxu1 }
 0x171   : > { %3690 = vst [vmem:[#allocation41_spill] sm:$0xff] %v3054_v41  ;;  %v1337_v47 = vsel %vm1322_vm3, %v1335_v36, %v3692_v9  ;;  %v977_v2 = vrot.slane %v3040_v45, 3  ;;  %v3073_v32 = vmul.f32 0.036000773, %v2231_v48  ;;  %v3077_v57 = vmul.f32 0.0010283801, %v2231_v48 }
 0x172   : > { %v3079_v31 = vmul.f32 0.10936069, %v2261_v44  ;;  %v1417_v29 = vadd.f32 %v1367_v50, %v1236_v37  ;;  %v1339_v24 = vrot.slane %v3056_v33, 5  ;;  %v1440_v54 = vrot.slane %v3049_v61, 6 }
 0x173   : > { %3693 = vst [vmem:[#allocation43_spill] sm:$0xff] %v3073_v32  ;;  %3694 = vst [vmem:[#allocation44_spill] sm:$0xff] %v3077_v57  ;;  %v3084_v15 = vadd.f32 %v1337_v47, %v1226_v58  ;;  %v3086_v51 = vmul.f32 0.21300554, %v2261_v44  ;;  %v3088_v8 = vmul.f32 0.26601171, %v2261_v44 }
 0x174   : > { %v685_v13 = vmul.f32 0.007598758, %v511_v46  ;;  %v3090_v6 = vmul.f32 0.036000773, %v2261_v44  ;;  %v785_v48 = vmul.f32 0.036000773, %v511_v46  ;;  %v1518_v47 = vadd.f32 %v1468_v17, %v1417_v29 }
 0x175   : > { %3695 = vst [vmem:[#allocation45_spill] sm:$0xff] %v3084_v15  ;;  %v3092_v53 = vmul.f32 0.10936069, %v511_v46  ;;  %v1007_v33 = vrot.slane %v3079_v31, 3  ;;  %v665_v58 = vmul.f32 0.0010283801, %v511_v46 }
 0x176   : > { %v725_v9 = vrot.slane %v685_v13, 1  ;;  %v1571_v50 = vrot.slane %v3079_v31, 7  ;;  %v3099_v5 = vmul.f32 0.007598758, %v2261_v44  ;;  %v1071_v36 = vmul.f32 0.21300554, %v511_v46 }
 0x177   : > { %3696 = vst [vmem:[#allocation46_spill] sm:$0xff] %v3092_v53  ;;  %v675_v38 = vmul.f32 0.0010283801, %v611_v18  ;;  %v695_v35 = vmul.f32 0.007598758, %v611_v18  ;;  %v825_v4 = vrot.slane %v785_v48, 2 }
 0x178   : > { %v765_v34 = vadd.f32 %v725_v9, %v665_v58  ;;  %v795_v3 = vmul.f32 0.036000773, %v611_v18  ;;  %v976_v32 = vrot.slane %v3092_v53, 3  ;;  %v1252_v63 = vmul.f32 0.26601171, %v511_v46 }
 0x179   : > { %v910_v42 = vmul.f32 0.10936069, %v611_v18  ;;  %v1188_v37 = vrot.slane %v3086_v51, 4  ;;  %v735_v57 = vrot.slane %v695_v35, 1  ;;  %v1091_v13 = vmul.f32 0.21300554, %v611_v18 }
 0x17a   : > { %v835_v45 = vrot.slane %v795_v3, 2  ;;  %v1369_v17 = vrot.slane %v3088_v8, 5  ;;  %v1470_v31 = vrot.slane %v3086_v51, 6  ;;  %v865_v29 = vadd.f32 %v825_v4, %v765_v34 }
 0x17b   : > { %v1006_v0 = vrot.slane %v910_v42, 3  ;;  %v3106_v9 = vmul.f32 0.0010283801, %v2261_v44  ;;  %v775_v48 = vadd.f32 %v735_v57, %v675_v38  ;;  %v3110_v46 = vadd.f32 %v2988_v10, %v3008_v30 }
 0x17c   : > { %v978_v35 = vsel %vm960_vm1, %v976_v32, %v977_v2  ;;  %v1157_v3 = vrot.slane %v1071_v36, 4  ;;  %v1338_v39 = vrot.slane %v1252_v63, 5  ;;  %v1439_v20 = vrot.slane %v1071_v36, 6 }
 0x17d   : > { %3697 = vst [vmem:[#allocation47_spill] sm:$0xff] %v3106_v9  ;;  %v875_v8 = vadd.f32 %v835_v45, %v775_v48  ;;  %v1008_v51 = vsel %vm960_vm1, %v1006_v0, %v1007_v33  ;;  %v1187_v34 = vrot.slane %v1091_v13, 4  ;;  %v1272_v4 = vmul.f32 0.26601171, %v611_v18  ;;  %v521_v48 = vpop.f32.mrf.mxu0 }
 0x17e   : > { %v1046_v56 = vadd.f32 %v978_v35, %v865_v29  ;;  %v1469_v58 = vrot.slane %v1091_v13, 6  ;;  %v1570_v44 = vrot.slane %v910_v42, 7  ;;  %v3114_v27 = vmul.f32 0.10936069, %v2234_v49  ;;  %v3141_v29 = vpop.f32.mrf.mxu1 }
 0x17f   : > { %v1619_v38 = vadd.f32 %v3070_v22, %v1518_v47  ;;  %v3118_v30 = vmul.f32 0.21300554, %v2234_v49  ;;  %v3698_v2 = vrot.slane %v2899_v62, 7  ;;  %v3699_v32 = vrot.slane %v2948_v11, 7  ;;  %3702 = vst [vmem:[#allocation49_spill] sm:$0xff] %v3141_v29 }
 0x180   : > { %v3700_v0 = vrot.slane %v3049_v61, 4  ;;  %v1056_v57 = vadd.f32 %v1008_v51, %v875_v8  ;;  %v3131_v18 = vmul.f32 0.26601171, %v2234_v49  ;;  %v1340_v22 = vsel %vm1322_vm3, %v1338_v39, %v1339_v24 }
 0x181   : > { %v3125_v45 = vsel %vm1524_vm5, %v3699_v32, %v3698_v2  ;;  %v3135_v63 = vsel %vm1423_vm4, %v1439_v20, %v1440_v54  ;;  %v1189_v62 = vsel %vm1141_vm2, %v1187_v34, %v1188_v37  ;;  %v1368_v11 = vrot.slane %v1272_v4, 5  ;;  %v621_v2 = vpop.f32.mrf.mxu1 }
 0x182   : > { %v1159_v36 = vsel %vm1141_vm2, %v1157_v3, %v3700_v0  ;;  %3701 = vst [vmem:[#allocation48_spill] sm:$0xff] %v3135_v63  ;;  %v1471_v47 = vsel %vm1423_vm4, %v1469_v58, %v1470_v31  ;;  %v1572_v61 = vsel %vm1524_vm5, %v1570_v44, %v1571_v50  ;;  %v980_v13 = vrot.slane %v3114_v27, 3  ;;  %v2237_v63 = vpop.f32.mrf.mxu0 }
 0x183   : > { %v1227_v33 = vadd.f32 %v1159_v36, %v1046_v56  ;;  %v1161_v35 = vrot.slane %v3118_v30, 4  ;;  %v3145_v24 = vmul.f32 0.036000773, %v2234_v49  ;;  %v3147_v20 = vmul.f32 0.007598758, %v2234_v49 }
 0x184   : > { %v1237_v54 = vadd.f32 %v1189_v62, %v1056_v57  ;;  %v1342_v56 = vrot.slane %v3131_v18, 5  ;;  %v1443_v37 = vrot.slane %v3118_v30, 6  ;;  %v3151_v31 = vmul.f32 0.0010283801, %v2234_v49 }
 0x185   : > { %v1370_v50 = vsel %vm1322_vm3, %v1368_v11, %v1369_v17  ;;  %v686_v58 = vmul.f32 0.007598758, %v521_v48  ;;  %v786_v3 = vmul.f32 0.036000773, %v521_v48  ;;  %v3154_v8 = vmul.f32 0.10936069, %v521_v48 }
 0x186   : > { %v3156_v51 = vadd.f32 %v1340_v22, %v1227_v33  ;;  %v3159_v34 = vmul.f32 0.10936069, %v3141_v29  ;;  %v3162_v4 = vmul.f32 0.21300554, %v3141_v29  ;;  %v1275_v44 = vmul.f32 0.26601171, %v3141_v29 }
 0x187   : > { %v3167_v30 = vmul.f32 0.036000773, %v3141_v29  ;;  %v666_v17 = vmul.f32 0.0010283801, %v521_v48  ;;  %v726_v32 = vrot.slane %v686_v58, 1  ;;  %v1418_v0 = vadd.f32 %v1370_v50, %v1237_v54 }
 0x188   : > { %3703 = vst [vmem:[#allocation50_spill] sm:$0xff] %v3156_v51  ;;  %3704 = vst [vmem:[#allocation51_spill] sm:$0xff] %v3159_v34  ;;  %v826_v36 = vrot.slane %v786_v3, 2  ;;  %v1073_v57 = vmul.f32 0.21300554, %v521_v48  ;;  %v979_v62 = vrot.slane %v3154_v8, 3  ;;  %v1659_v49 = vadd.f32 %v3014_v28, %v1619_v38 }
 0x189   : > { %3705 = vst [vmem:[#allocation52_spill] sm:$0xff] %v3162_v4  ;;  %3706 = vst [vmem:[#allocation53_spill] sm:$0xff] %v3167_v30  ;;  %v676_v18 = vmul.f32 0.0010283801, %v621_v2  ;;  %v766_v22 = vadd.f32 %v726_v32, %v666_v17  ;;  %v696_v11 = vmul.f32 0.007598758, %v621_v2  ;;  %v1519_v3 = vadd.f32 %v1471_v47, %v1418_v0 }
 0x18a   : > { %v796_v33 = vmul.f32 0.036000773, %v621_v2  ;;  %v3171_v42 = vmul.f32 0.007598758, %v3141_v29  ;;  %v1254_v10 = vmul.f32 0.26601171, %v521_v48  ;;  %v981_v29 = vsel %vm960_vm1, %v979_v62, %v980_v13 }
 0x18b   : > { %v3173_v39 = vmul.f32 0.10936069, %v621_v2  ;;  %v1010_v30 = vrot.slane %v3159_v34, 3  ;;  %v1191_v54 = vrot.slane %v3162_v4, 4  ;;  %v866_v50 = vadd.f32 %v826_v36, %v766_v22 }
 0x18c   : > { %3707 = vst [vmem:[#allocation54_spill] sm:$0xff] %v3171_v42  ;;  %v736_v58 = vrot.slane %v696_v11, 1  ;;  %v836_v17 = vrot.slane %v796_v33, 2  ;;  %v3178_v32 = vmul.f32 0.21300554, %v621_v2  ;;  %v1160_v51 = vrot.slane %v1073_v57, 4 }
 0x18d   : > { %3708 = vst [vmem:[#allocation55_spill] sm:$0xff] %v3173_v39  ;;  %v1274_v53 = vmul.f32 0.26601171, %v621_v2  ;;  %v1009_v60 = vrot.slane %v3173_v39, 3  ;;  %v1372_v43 = vrot.slane %v1275_v44, 5  ;;  %v1047_v38 = vadd.f32 %v981_v29, %v866_v50 }
 0x18e   : > { %3709 = vst [vmem:[#allocation56_spill] sm:$0xff] %v3178_v32  ;;  %v776_v48 = vadd.f32 %v736_v58, %v676_v18  ;;  %v1341_v41 = vrot.slane %v1254_v10, 5  ;;  %v1442_v0 = vrot.slane %v1073_v57, 6  ;;  %v3185_v22 = vmul.f32 0.10936069, %v2237_v63 }
 0x18f   : > { %v1190_v11 = vrot.slane %v3178_v32, 4  ;;  %v1371_v13 = vrot.slane %v1274_v53, 5  ;;  %v3188_v62 = vmul.f32 0.21300554, %v2237_v63  ;;  %v3190_v18 = vadd.f32 %v1572_v61, %v1519_v3 }
 0x190   : > { %v876_v2 = vadd.f32 %v836_v17, %v776_v48  ;;  %v1162_v44 = vsel %vm1141_vm2, %v1160_v51, %v1161_v35  ;;  %v1011_v29 = vsel %vm960_vm1, %v1009_v60, %v1010_v30  ;;  %v3710_v10 = vrot.slane %v3017_v26, 1 }
 0x191   : > { %v1228_v50 = vadd.f32 %v1162_v44, %v1047_v38  ;;  %v1343_v57 = vsel %vm1322_vm3, %v1341_v41, %v1342_v56  ;;  %v1543_v58 = vrot.slane %v3154_v8, 7  ;;  %v3200_v17 = vmul.f32 0.26601171, %v2237_v63  ;;  %v3209_v41 = vpop.f32.mrf.mxu1  ;;  %v531_v56 = vpop.f32.mrf.mxu0 }
 0x192   : > { %v3196_v33 = vadd.f32 %v3710_v10, %v1659_v49  ;;  %v1444_v53 = vsel %vm1423_vm4, %v1442_v0, %v1443_v37  ;;  %v983_v35 = vrot.slane %v3185_v22, 3  ;;  %v1057_v60 = vadd.f32 %v1011_v29, %v876_v2  ;;  %3711 = vst [vmem:[#allocation57_spill] sm:$0xff] %v3209_v41 }
 0x193   : > { %v1192_v26 = vsel %vm1141_vm2, %v1190_v11, %v1191_v54  ;;  %v1373_v51 = vsel %vm1322_vm3, %v1371_v13, %v1372_v43  ;;  %v1164_v49 = vrot.slane %v3188_v62, 4  ;;  %v3213_v30 = vmul.f32 0.007598758, %v2237_v63  ;;  %v2240_v4 = vpop.f32.mrf.mxu0 }
 0x194   : > { %v3215_v48 = vmul.f32 0.0010283801, %v2237_v63  ;;  %v1409_v38 = vadd.f32 %v1343_v57, %v1228_v50  ;;  %v1345_v0 = vrot.slane %v3200_v17, 5  ;;  %v3218_v2 = vmul.f32 0.036000773, %v2237_v63  ;;  %v631_v57 = vpop.f32.mrf.mxu1 }
 0x195   : > { %v3221_v43 = vmul.f32 0.10936069, %v3209_v41  ;;  %v3224_v54 = vmul.f32 0.21300554, %v3209_v41  ;;  %v687_v11 = vmul.f32 0.007598758, %v531_v56  ;;  %v1238_v10 = vadd.f32 %v1192_v26, %v1057_v60 }
 0x196   : > { %v787_v13 = vmul.f32 0.036000773, %v531_v56  ;;  %v3713_v44 = vrot.slane %v3114_v27, 7  ;;  %v1277_v47 = vmul.f32 0.26601171, %v3209_v41 }
 0x197   : > { %3712 = vst [vmem:[#allocation58_spill] sm:$0xff] %v3221_v43  ;;  %v3231_v50 = vmul.f32 0.036000773, %v3209_v41  ;;  %v3233_v63 = vmul.f32 0.10936069, %v531_v56  ;;  %v727_v61 = vrot.slane %v687_v11, 1 }
 0x198   : > { %v1545_v29 = vsel %vm1524_vm5, %v1543_v58, %v3713_v44  ;;  %v667_v36 = vmul.f32 0.0010283801, %v531_v56  ;;  %v1013_v28 = vrot.slane %v3221_v43, 3  ;;  %v827_v58 = vrot.slane %v787_v13, 2 }
 0x199   : > { %3714 = vst [vmem:[#allocation59_spill] sm:$0xff] %v3231_v50  ;;  %v1075_v60 = vmul.f32 0.21300554, %v531_v56  ;;  %v677_v44 = vmul.f32 0.0010283801, %v631_v57  ;;  %v3239_v50 = vadd.f32 %v1373_v51, %v1238_v10  ;;  %v982_v42 = vrot.slane %v3233_v63, 3 }
 0x19a   : > { %v767_v26 = vadd.f32 %v727_v61, %v667_v36  ;;  %v697_v37 = vmul.f32 0.007598758, %v631_v57  ;;  %v797_v8 = vmul.f32 0.036000773, %v631_v57  ;;  %v1256_v39 = vmul.f32 0.26601171, %v531_v56 }
 0x19b   : > { %3715 = vst [vmem:[#allocation60_spill] sm:$0xff] %v3239_v50  ;;  %v3242_v17 = vmul.f32 0.10936069, %v631_v57  ;;  %v1095_v32 = vmul.f32 0.21300554, %v631_v57  ;;  %v1194_v27 = vrot.slane %v3224_v54, 4  ;;  %v1510_v50 = vadd.f32 %v1444_v53, %v1409_v38 }
 0x19c   : > { %v867_v3 = vadd.f32 %v827_v58, %v767_v26  ;;  %v737_v34 = vrot.slane %v697_v37, 1  ;;  %v837_v11 = vrot.slane %v797_v8, 2  ;;  %v1375_v13 = vrot.slane %v1277_v47, 5 }
 0x19d   : > { %3716 = vst [vmem:[#allocation61_spill] sm:$0xff] %v3242_v17  ;;  %v1012_v36 = vrot.slane %v3242_v17, 3  ;;  %v1276_v61 = vmul.f32 0.26601171, %v631_v57  ;;  %v1476_v43 = vrot.slane %v3224_v54, 6  ;;  %v1163_v51 = vrot.slane %v1075_v60, 4 }
 0x19e   : > { %v777_v10 = vadd.f32 %v737_v34, %v677_v44  ;;  %v984_v56 = vsel %vm960_vm1, %v982_v42, %v983_v35  ;;  %v1344_v15 = vrot.slane %v1256_v39, 5  ;;  %v1445_v52 = vrot.slane %v1075_v60, 6 }
 0x19f   : > { %v3248_v58 = vmul.f32 0.10936069, %v2240_v4  ;;  %v1048_v8 = vadd.f32 %v984_v56, %v867_v3  ;;  %v1014_v26 = vsel %vm960_vm1, %v1012_v36, %v1013_v28  ;;  %v1193_v7 = vrot.slane %v1095_v32, 4 }
 0x1a0   : > { %v877_v37 = vadd.f32 %v837_v11, %v777_v10  ;;  %v3252_v47 = vmul.f32 0.007598758, %v3209_v41  ;;  %v1374_v57 = vrot.slane %v1276_v61, 5  ;;  %v1475_v21 = vrot.slane %v1095_v32, 6 }
 0x1a1   : > { %v3254_v54 = vmul.f32 0.21300554, %v2240_v4  ;;  %v1165_v34 = vsel %vm1141_vm2, %v1163_v51, %v1164_v49  ;;  %v1611_v39 = vadd.f32 %v1545_v29, %v1510_v50  ;;  %v3718_v53 = vrot.slane %v3030_v25, 2  ;;  %v3274_v25 = vpop.f32.mrf.mxu1 }
 0x1a2   : > { %3717 = vst [vmem:[#allocation62_spill] sm:$0xff] %v3252_v47  ;;  %v1346_v28 = vsel %vm1322_vm3, %v1344_v15, %v1345_v0  ;;  %v3719_v35 = vrot.slane %v3188_v62, 6  ;;  %v1058_v32 = vadd.f32 %v1014_v26, %v877_v37  ;;  %v3269_v60 = vmul.f32 0.26601171, %v2240_v4  ;;  %v541_v0 = vpop.f32.mrf.mxu0 }
 0x1a3   : > { %v3261_v3 = vadd.f32 %v3718_v53, %v3196_v33  ;;  %v1229_v44 = vadd.f32 %v1165_v34, %v1048_v8  ;;  %v1195_v49 = vsel %vm1141_vm2, %v1193_v7, %v1194_v27  ;;  %v986_v50 = vrot.slane %v3248_v58, 3  ;;  %v641_v37 = vpop.f32.mrf.mxu1 }
 0x1a4   : > { %v3267_v38 = vsel %vm1423_vm4, %v1445_v52, %v3719_v35  ;;  %v1376_v33 = vsel %vm1322_vm3, %v1374_v57, %v1375_v13  ;;  %v3278_v15 = vsel %vm1423_vm4, %v1475_v21, %v1476_v43  ;;  %v1167_v52 = vrot.slane %v3254_v54, 4 }
 0x1a5   : > { %3720 = vst [vmem:[#allocation63_spill] sm:$0xff] %v3278_v15  ;;  %v3281_v62 = vmul.f32 0.007598758, %v2240_v4  ;;  %v3285_v27 = vmul.f32 0.036000773, %v2240_v4  ;;  %v1239_v61 = vadd.f32 %v1195_v49, %v1058_v32  ;;  %v1348_v51 = vrot.slane %v3269_v60, 5 }
 0x1a6   : > { %v3287_v36 = vmul.f32 0.0010283801, %v2240_v4  ;;  %v3291_v13 = vmul.f32 0.10936069, %v3274_v25  ;;  %v3294_v21 = vmul.f32 0.21300554, %v3274_v25  ;;  %v1410_v43 = vadd.f32 %v1346_v28, %v1229_v44 }
 0x1a7   : > { %3721 = vst [vmem:[#allocation64_spill] sm:$0xff] %v3281_v62  ;;  %3722 = vst [vmem:[#allocation65_spill] sm:$0xff] %v3285_v27  ;;  %v688_v10 = vmul.f32 0.007598758, %v541_v0  ;;  %v788_v56 = vmul.f32 0.036000773, %v541_v0  ;;  %v1651_v34 = vadd.f32 %v3145_v24, %v1611_v39  ;;  %v3306_v60 = vadd.f32 %v1376_v33, %v1239_v61 }
 0x1a8   : > { %3723 = vst [vmem:[#allocation66_spill] sm:$0xff] %v3287_v36  ;;  %v896_v8 = vmul.f32 0.10936069, %v541_v0  ;;  %v1279_v57 = vmul.f32 0.26601171, %v3274_v25  ;;  %v1016_v41 = vrot.slane %v3291_v13, 3 }
 0x1a9   : > { %v3299_v4 = vmul.f32 0.036000773, %v3274_v25  ;;  %v3304_v35 = vmul.f32 0.007598758, %v3274_v25  ;;  %v668_v32 = vmul.f32 0.0010283801, %v541_v0 }
 0x1aa   : > { %v728_v28 = vrot.slane %v688_v10, 1  ;;  %3724 = vst [vmem:[#allocation67_spill] sm:$0xff] %v3306_v60  ;;  %v1077_v44 = vmul.f32 0.21300554, %v541_v0  ;;  %v678_v49 = vmul.f32 0.0010283801, %v641_v37 }
 0x1ab   : > { %v698_v29 = vmul.f32 0.007598758, %v641_v37  ;;  %v828_v42 = vrot.slane %v788_v56, 2  ;;  %v985_v7 = vrot.slane %v896_v8, 3  ;;  %v798_v11 = vmul.f32 0.036000773, %v641_v37 }
 0x1ac   : > { %v768_v26 = vadd.f32 %v728_v28, %v668_v32  ;;  %v1197_v24 = vrot.slane %v3294_v21, 4  ;;  %v1258_v39 = vmul.f32 0.26601171, %v541_v0  ;;  %v3310_v15 = vmul.f32 0.10936069, %v641_v37 }
 0x1ad   : > { %v738_v53 = vrot.slane %v698_v29, 1  ;;  %v838_v17 = vrot.slane %v798_v11, 2  ;;  %v1097_v10 = vmul.f32 0.21300554, %v641_v37  ;;  %v1378_v33 = vrot.slane %v1279_v57, 5  ;;  %v2243_v29 = vpop.f32.mrf.mxu0 }
 0x1ae   : > { %v868_v47 = vadd.f32 %v828_v42, %v768_v26  ;;  %v1549_v61 = vrot.slane %v896_v8, 7  ;;  %v1278_v36 = vmul.f32 0.26601171, %v641_v37  ;;  %v987_v32 = vsel %vm960_vm1, %v985_v7, %v986_v50 }
 0x1af   : > { %v778_v60 = vadd.f32 %v738_v53, %v678_v49  ;;  %v1166_v56 = vrot.slane %v1077_v44, 4  ;;  %v1015_v28 = vrot.slane %v3310_v15, 3  ;;  %v1196_v62 = vrot.slane %v1097_v10, 4 }
 0x1b0   : > { %v1049_v27 = vadd.f32 %v987_v32, %v868_v47  ;;  %v1347_v9 = vrot.slane %v1258_v39, 5  ;;  %v1448_v12 = vrot.slane %v1077_v44, 6  ;;  %v1479_v42 = vrot.slane %v3294_v21, 6  ;;  %v2273_v39 = vpop.f32.mrf.mxu1 }
 0x1b1   : > { %v878_v0 = vadd.f32 %v838_v17, %v778_v60  ;;  %v1580_v11 = vrot.slane %v3291_v13, 7  ;;  %v1017_v8 = vsel %vm960_vm1, %v1015_v28, %v1016_v41  ;;  %v1198_v50 = vsel %vm1141_vm2, %v1196_v62, %v1197_v24 }
 0x1b2   : > { %v1377_v7 = vrot.slane %v1278_v36, 5  ;;  %v3725_v57 = vrot.slane %v3147_v20, 1  ;;  %v1168_v47 = vsel %vm1141_vm2, %v1166_v56, %v1167_v52  ;;  %v3324_v17 = vmul.f32 0.10936069, %v2243_v29 }
 0x1b3   : > { %v1059_v37 = vadd.f32 %v1017_v8, %v878_v0  ;;  %v3326_v60 = vmul.f32 0.21300554, %v2243_v29  ;;  %v3329_v13 = vadd.f32 %v3267_v38, %v1410_v43  ;;  %v1230_v21 = vadd.f32 %v1168_v47, %v1049_v27 }
 0x1b4   : > { %v3321_v53 = vadd.f32 %v3725_v57, %v1651_v34  ;;  %v1349_v41 = vsel %vm1322_vm3, %v1347_v9, %v1348_v51  ;;  %v3726_v44 = vrot.slane %v3254_v54, 6  ;;  %v3727_v20 = vrot.slane %v3248_v58, 7  ;;  %v651_v57 = vpop.f32.mrf.mxu1 }
 0x1b5   : > { %v1240_v34 = vadd.f32 %v1198_v50, %v1059_v37  ;;  %v1478_v52 = vrot.slane %v1097_v10, 6  ;;  %v3338_v49 = vmul.f32 0.26601171, %v2243_v29  ;;  %v3340_v24 = vmul.f32 0.007598758, %v2243_v29 }
 0x1b6   : > { %v1450_v62 = vsel %vm1423_vm4, %v1448_v12, %v3726_v44  ;;  %v1551_v36 = vsel %vm1524_vm5, %v1549_v61, %v3727_v20  ;;  %v1379_v38 = vsel %vm1322_vm3, %v1377_v7, %v1378_v33  ;;  %v1579_v27 = vrot.slane %v3310_v15, 7  ;;  %v551_v12 = vpop.f32.mrf.mxu0 }
 0x1b7   : > { %3728 = vst [vmem:[#allocation68_spill] sm:$0xff] %v3338_v49  ;;  %3729 = vst [vmem:[#allocation69_spill] sm:$0xff] %v3340_v24  ;;  %v3344_v9 = vmul.f32 0.0010283801, %v2243_v29  ;;  %v3346_v54 = vmul.f32 0.10936069, %v2273_v39  ;;  %v1411_v61 = vadd.f32 %v1349_v41, %v1230_v21  ;;  %v1421_v15 = vadd.f32 %v1379_v38, %v1240_v34 }
 0x1b8   : > { %v3350_v43 = vmul.f32 0.21300554, %v2273_v39  ;;  %v1281_v10 = vmul.f32 0.26601171, %v2273_v39  ;;  %v3354_v33 = vmul.f32 0.036000773, %v2243_v29  ;;  %v1480_v47 = vsel %vm1423_vm4, %v1478_v52, %v1479_v42 }
 0x1b9   : > { %3730 = vst [vmem:[#allocation70_spill] sm:$0xff] %v3344_v9  ;;  %v689_v8 = vmul.f32 0.007598758, %v551_v12  ;;  %v1019_v50 = vrot.slane %v3346_v54, 3  ;;  %v1512_v20 = vadd.f32 %v1450_v62, %v1411_v61  ;;  %v3364_v34 = vmul.f32 0.036000773, %v2273_v39 }
 0x1ba   : > { %3731 = vst [vmem:[#allocation71_spill] sm:$0xff] %v3354_v33  ;;  %v1200_v21 = vrot.slane %v3350_v43, 4  ;;  %v1381_v41 = vrot.slane %v1281_v10, 5  ;;  %v1482_v29 = vrot.slane %v3350_v43, 6  ;;  %v669_v38 = vmul.f32 0.0010283801, %v551_v12 }
 0x1bb   : > { %v729_v44 = vrot.slane %v689_v8, 1  ;;  %3732 = vst [vmem:[#allocation72_spill] sm:$0xff] %v3364_v34  ;;  %v789_v0 = vmul.f32 0.036000773, %v551_v12  ;;  %v679_v56 = vmul.f32 0.0010283801, %v651_v57  ;;  %v1522_v28 = vadd.f32 %v1480_v47, %v1421_v15 }
 0x1bc   : > { %v699_v37 = vmul.f32 0.007598758, %v651_v57  ;;  %v799_v32 = vmul.f32 0.036000773, %v651_v57  ;;  %v3366_v51 = vmul.f32 0.007598758, %v2273_v39  ;;  %v1581_v52 = vsel %vm1524_vm5, %v1579_v27, %v1580_v11 }
 0x1bd   : > { %v3368_v26 = vmul.f32 0.0010283801, %v2273_v39  ;;  %v3370_v42 = vmul.f32 0.10936069, %v551_v12  ;;  %v769_v10 = vadd.f32 %v729_v44, %v669_v38  ;;  %v3373_v43 = vmul.f32 0.21300554, %v551_v12 }
 0x1be   : > { %v739_v62 = vrot.slane %v699_v37, 1  ;;  %v839_v61 = vrot.slane %v799_v32, 2  ;;  %v3375_v8 = vadd.f32 %v1551_v36, %v1512_v20  ;;  %v918_v7 = vmul.f32 0.10936069, %v651_v57 }
 0x1bf   : > { %3733 = vst [vmem:[#allocation73_spill] sm:$0xff] %v3368_v26  ;;  %v1099_v58 = vmul.f32 0.21300554, %v651_v57  ;;  %v1280_v9 = vmul.f32 0.26601171, %v651_v57  ;;  %v829_v24 = vrot.slane %v789_v0, 2  ;;  %v1623_v33 = vadd.f32 %v1581_v52, %v1522_v28 }
 0x1c0   : > { %v1260_v15 = vmul.f32 0.26601171, %v551_v12  ;;  %v779_v47 = vadd.f32 %v739_v62, %v679_v56  ;;  %v1724_v39 = vrot.slane %v3366_v51, 1  ;;  %v1018_v26 = vrot.slane %v918_v7, 3 }
 0x1c1   : > { %v1199_v34 = vrot.slane %v1099_v58, 4  ;;  %v1380_v49 = vrot.slane %v1280_v9, 5  ;;  %v869_v11 = vadd.f32 %v829_v24, %v769_v10  ;;  %v988_v27 = vrot.slane %v3370_v42, 3 }
 0x1c2   : > { %v1169_v37 = vrot.slane %v3373_v43, 4  ;;  %v879_v32 = vadd.f32 %v839_v61, %v779_v47  ;;  %v1020_v36 = vsel %vm960_vm1, %v1018_v26, %v1019_v50  ;;  %v1481_v57 = vrot.slane %v1099_v58, 6 }
 0x1c3   : > { %v1201_v44 = vsel %vm1141_vm2, %v1199_v34, %v1200_v21  ;;  %v1811_v12 = vrot.slane %v3151_v31, 2  ;;  %v1350_v56 = vrot.slane %v1260_v15, 5  ;;  %v1582_v0 = vrot.slane %v918_v7, 7 }
 0x1c4   : > { %v1060_v28 = vadd.f32 %v1020_v36, %v879_v32  ;;  %v1663_v20 = vadd.f32 %v3299_v4, %v1623_v33  ;;  %v1382_v9 = vsel %vm1322_vm3, %v1380_v49, %v1381_v41  ;;  %v3734_v38 = vrot.slane %v3185_v22, 7 }
 0x1c5   : > { %v1851_v24 = vadd.f32 %v1811_v12, %v3321_v53  ;;  %v3735_v52 = vrot.slane %v3233_v63, 7  ;;  %v1608_v58 = vadd.f32 %v3125_v45, %v3110_v46  ;;  %v3736_v31 = vrot.slane %v3324_v17, 3 }
 0x1c6   : > { %v1241_v7 = vadd.f32 %v1201_v44, %v1060_v28  ;;  %v1783_v4 = vmul.f32 0.0010283801, %v3274_v25  ;;  %v1483_v53 = vsel %vm1423_vm4, %v1481_v57, %v1482_v29  ;;  %v1656_v46 = vadd.f32 %v2828_v1, %v2902_v55  ;;  %v3747_v28 = vld [vmem:[#allocation68_spill] sm:$0xff] }
 0x1c7   : > { %v1548_v26 = vsel %vm1524_vm5, %v3735_v52, %v3734_v38  ;;  %v990_v50 = vsel %vm960_vm1, %v988_v27, %v3736_v31  ;;  %v1871_v22 = vmul.f32 %v1851_v24, %v1851_v24  ;;  %v1648_v63 = vadd.f32 %v2929_v40, %v1608_v58 }
 0x1c8   : > { %v1612_v49 = vadd.f32 %v1548_v26, %v3329_v13  ;;  %v1050_v33 = vadd.f32 %v990_v50, %v869_v11  ;;  %v1422_v21 = vadd.f32 %v1382_v9, %v1241_v7  ;;  %v1660_v45 = vadd.f32 %v3090_v6, %v3190_v18  ;;  %v3752_v26 = vld [vmem:[#allocation47_spill] sm:$0xff] }
 0x1c9   : > { %v3737_v34 = vrot.slane %v3346_v54, 7  ;;  %v3738_v13 = vrot.slane %v3304_v35, 1  ;;  %v1883_v29 = vsub.f32 %v3261_v3, %v1871_v22  ;;  %v1911_v40 = vadd.f32 %v1871_v22, %v3066_v23  ;;  %v3758_v22 = vld [vmem:[#allocation41_spill] sm:$0xff] }
 0x1ca   : > { %v1652_v41 = vadd.f32 %v3218_v2, %v1612_v49  ;;  %v1523_v62 = vadd.f32 %v1483_v53, %v1422_v21  ;;  %v1823_v61 = vrot.slane %v1783_v4, 2  ;;  %v3739_v2 = vrot.slane %v2920_v14, 1  ;;  %v3755_v49 = vld [vmem:[#allocation20_spill] sm:$0xff] }
 0x1cb   : > { %v1584_v25 = vsel %vm1524_vm5, %v1582_v0, %v3737_v34  ;;  %v1763_v10 = vadd.f32 %v3738_v13, %v1663_v20  ;;  %v3740_v1 = vrot.slane %v3213_v30, 1  ;;  %v3741_v6 = vrot.slane %v3326_v60, 4  ;;  %v3749_v20 = vld [vmem:[#allocation72_spill] sm:$0xff] }
 0x1cc   : > { %v1748_v15 = vadd.f32 %v3739_v2, %v1648_v63  ;;  %v1451_v54 = vrot.slane %v3373_v43, 6  ;;  %v1552_v35 = vrot.slane %v3370_v42, 7  ;;  %v3742_v3 = vsub.f32 %v2936_v16, %v3066_v23 }
 0x1cd   : > { %v1752_v55 = vadd.f32 %v3740_v1, %v1652_v41  ;;  %v1171_v18 = vsel %vm1141_vm2, %v1169_v37, %v3741_v6  ;;  %v1624_v27 = vadd.f32 %v1584_v25, %v1523_v62  ;;  %v3743_v14 = vrot.slane %v2831_v59, 1  ;;  %v3750_v59 = vld [vmem:[#allocation23_spill] sm:$0xff] }
 0x1ce   : > { %v1919_v47 = vadd.f32 %v1883_v29, %v3742_v3  ;;  %v1231_v11 = vadd.f32 %v1171_v18, %v1050_v33  ;;  %v3744_v30 = vrot.slane %v3099_v5, 1  ;;  %v1915_v44 = vadd.f32 0.0001, %v1911_v40  ;;  %v3756_v33 = vld [vmem:[#allocation17_spill] sm:$0xff]  ;;  %v3770_v3 = vld [vmem:[#allocation52_spill] sm:$0xff] }
 0x1cf   : > { %v1756_v32 = vadd.f32 %v3743_v14, %v1656_v46  ;;  %v3745_v37 = vrot.slane %v2931_v19, 2  ;;  %v3746_v43 = vrot.slane %v3215_v48, 2  ;;  %v3748_v0 = vrot.slane %v3747_v28, 5  ;;  %v3754_v48 = vld [vmem:[#allocation38_spill] sm:$0xff]  ;;  %v3768_v18 = vld [vmem:[#allocation37_spill] sm:$0xff] }
 0x1d0   : > { %v1760_v36 = vadd.f32 %v3744_v30, %v1660_v45  ;;  %v1923_v57 = vadd.f32 0.0009, %v1919_v47  ;;  %v1863_v23 = vadd.f32 %v1823_v61, %v1763_v10  ;;  %v1664_v9 = vadd.f32 %v3749_v20, %v1624_v27  ;;  %v3761_v10 = vld [vmem:[#allocation73_spill] sm:$0xff]  ;;  %v3762_v61 = vld [vmem:[#allocation11_spill] sm:$0xff]  ;;  %v3778_v20 = vld [vmem:[#allocation34_spill] sm:$0xff] }
 0x1d1   : > { %v1848_v12 = vadd.f32 %v3745_v37, %v1748_v15  ;;  %v1852_v42 = vadd.f32 %v3746_v43, %v1752_v55  ;;  %v1352_v16 = vsel %vm1322_vm3, %v1350_v56, %v3748_v0  ;;  %v3751_v38 = vrot.slane %v3750_v59, 2  ;;  %v3757_v56 = vld [vmem:[#allocation45_spill] sm:$0xff]  ;;  %v3764_v15 = vld [vmem:[#allocation15_spill] sm:$0xff]  ;;  %v3776_v37 = vld [vmem:[#allocation26_spill] sm:$0xff] }
 0x1d2   : > { %v3438_v5 = vmul.f32 %v1923_v57, %v1915_v44  ;;  %v3753_v58 = vrot.slane %v3752_v26, 2  ;;  %v1412_v7 = vadd.f32 %v1352_v16, %v1231_v11  ;;  %v1875_v4 = vmul.f32 %v1851_v24, %v3754_v48  ;;  %v3772_v11 = vld [vmem:[#allocation56_spill] sm:$0xff]  ;;  %v3775_v57 = vld [vmem:[#allocation33_spill] sm:$0xff] }
 0x1d3   : > { %v1856_v52 = vadd.f32 %v3751_v38, %v1756_v32  ;;  %v1868_v19 = vmul.f32 %v1848_v12, %v1848_v12  ;;  %v1872_v50 = vmul.f32 %v1852_v42, %v1852_v42  ;;  %v1504_v53 = vadd.f32 %v3756_v33, %v3755_v49  ;;  %v3777_v16 = vld [vmem:[#allocation13_spill] sm:$0xff]  ;;  %v3779_v26 = vld [vmem:[#allocation64_spill] sm:$0xff]  ;;  %v3784_v49 = vld [vmem:[#allocation35_spill] sm:$0xff] }
 0x1d4   : > { %v1860_v31 = vadd.f32 %v3753_v58, %v1760_v36  ;;  %v1508_v63 = vadd.f32 %v3758_v22, %v3757_v56  ;;  %2331 = vrcp.f32 %v3438_v5  ;;  %v3759_v45 = vrot.slane %v3326_v60, 6  ;;  %v3766_v60 = vld [vmem:[#allocation32_spill] sm:$0xff]  ;;  %v3774_v36 = vld [vmem:[#allocation65_spill] sm:$0xff]  ;;  %v3787_v22 = vld [vmem:[#allocation51_spill] sm:$0xff] }
 0x1d5   : > { %v1880_v21 = vsub.f32 %v1856_v52, %v1868_v19  ;;  %v1912_v46 = vadd.f32 %v1872_v50, %v1868_v19  ;;  %v3760_v25 = vrot.slane %v3324_v17, 7  ;;  %v1887_v24 = vsub.f32 %v1863_v23, %v1875_v4  ;;  %v3781_v19 = vld [vmem:[#allocation60_spill] sm:$0xff] }
 0x1d6   : > { %v1884_v41 = vsub.f32 %v1860_v31, %v1872_v50  ;;  %v1453_v34 = vsel %vm1423_vm4, %v1451_v54, %v3759_v45  ;;  %v1824_v29 = vrot.slane %v3761_v10, 2  ;;  %v1764_v40 = vadd.f32 %v1724_v39, %v1664_v9 }
 0x1d7   : > { %v1554_v13 = vsel %vm1524_vm5, %v1552_v35, %v3760_v25  ;;  %v3763_v2 = vrot.slane %v3762_v61, 7  ;;  %v3765_v1 = vrot.slane %v3764_v15, 7  ;;  %v3767_v6 = vrot.slane %v3766_v60, 7 }
 0x1d8   : > { %v1920_v62 = vadd.f32 %v1884_v41, %v1880_v21  ;;  %v3769_v54 = vrot.slane %v3768_v18, 7  ;;  %v1513_v35 = vadd.f32 %v1453_v34, %v1412_v7  ;;  %v3771_v47 = vrot.slane %v3770_v3, 6  ;;  %v3782_v7 = vld [vmem:[#allocation12_spill] sm:$0xff]  ;;  %v3791_v41 = vld [vmem:[#allocation27_spill] sm:$0xff] }
 0x1d9   : > { %v1527_v55 = vsel %vm1524_vm5, %v3765_v1, %v3763_v2  ;;  %v3773_v27 = vrot.slane %v3772_v11, 6  ;;  %v1916_v32 = vadd.f32 0.0001, %v1912_v46  ;;  %v1653_v44 = vadd.f32 %v3774_v36, %v3375_v8  ;;  %v3793_v34 = vld [vmem:[#allocation36_spill] sm:$0xff]  ;;  %v3796_v1 = vld [vmem:[#allocation25_spill] sm:$0xff]  ;;  %v3802_v11 = vld [vmem:[#allocation22_spill] sm:$0xff] }
 0x1da   : > { %v1539_v17 = vsel %vm1524_vm5, %v3769_v54, %v3767_v6  ;;  %v1605_v39 = vadd.f32 %v1527_v55, %v1504_v53  ;;  %v1924_v30 = vadd.f32 0.0009, %v1920_v62  ;;  %v1657_v43 = vadd.f32 %v3776_v37, %v3775_v57  ;;  %v3786_v53 = vld [vmem:[#allocation14_spill] sm:$0xff]  ;;  %v3797_v55 = vld [vmem:[#allocation24_spill] sm:$0xff]  ;;  %v3806_v36 = vld [vmem:[#allocation39_spill] sm:$0xff] }
 0x1db   : > { %v1474_v51 = vsel %vm1423_vm4, %v3773_v27, %v3771_v47  ;;  %v1609_v14 = vadd.f32 %v1539_v17, %v1508_v63  ;;  %v1891_v28 = vmul.f32 2.0, %v1875_v4  ;;  %v1899_v0 = vmul.f32 2.0, %v1887_v24  ;;  %v3798_v6 = vld [vmem:[#allocation50_spill] sm:$0xff]  ;;  %v3799_v18 = vld [vmem:[#allocation48_spill] sm:$0xff] }
 0x1dc   : > { %v1645_v23 = vadd.f32 %v3777_v16, %v1605_v39  ;;  %v1864_v59 = vadd.f32 %v1824_v29, %v1764_v40  ;;  %v1876_v38 = vmul.f32 %v1852_v42, %v1848_v12  ;;  %v3478_v52 = vmul.f32 %v1924_v30, %v1916_v32  ;;  %v3789_v12 = vld [vmem:[#allocation55_spill] sm:$0xff]  ;;  %v3794_v40 = vld [vmem:[#allocation66_spill] sm:$0xff]  ;;  %v3804_v39 = vld [vmem:[#allocation28_spill] sm:$0xff] }
 0x1dd   : > { %v1649_v9 = vadd.f32 %v3778_v20, %v1609_v14  ;;  %v3780_v58 = vrot.slane %v3779_v26, 1  ;;  %v1520_v50 = vadd.f32 %v1474_v51, %v3781_v19  ;;  %v3783_v8 = vrot.slane %v3782_v7, 1  ;;  %v3808_v57 = vld [vmem:[#allocation46_spill] sm:$0xff]  ;;  %v3810_v16 = vld [vmem:[#allocation71_spill] sm:$0xff]  ;;  %v3811_v19 = vld [vmem:[#allocation40_spill] sm:$0xff] }
 0x1de   : > { %v3785_v33 = vrot.slane %v3784_v49, 1  ;;  %v1805_v56 = vrot.slane %v3786_v53, 2  ;;  %2333 = vrcp.f32 %v3478_v52  ;;  %v3788_v63 = vrot.slane %v3787_v22, 7  ;;  %v3815_v53 = vld [vmem:[#allocation43_spill] sm:$0xff] }
 0x1df   : > { %v1753_v31 = vadd.f32 %v3780_v58, %v1653_v44  ;;  %v1745_v48 = vadd.f32 %v3783_v8, %v1645_v23  ;;  %v3790_v42 = vrot.slane %v3789_v12, 7  ;;  %v3792_v46 = vrot.slane %v3791_v41, 1  ;;  %v3813_v8 = vld [vmem:[#allocation53_spill] sm:$0xff]  ;;  %v3818_v41 = vld [vmem:[#allocation63_spill] sm:$0xff] }
 0x1e0   : > { %v1749_v4 = vadd.f32 %v3785_v33, %v1649_v9  ;;  %v1809_v25 = vrot.slane %v3793_v34, 2  ;;  %v1614_v24 = vadd.f32 %v1554_v13, %v1513_v35  ;;  %v1903_v10 = vadd.f32 0.0009, %v1899_v0  ;;  %v3800_v35 = vld [vmem:[#allocation16_spill] sm:$0xff]  ;;  %v3814_v33 = vld [vmem:[#allocation18_spill] sm:$0xff]  ;;  %v3821_v34 = vld [vmem:[#allocation61_spill] sm:$0xff] }
 0x1e1   : > { %v1575_v21 = vsel %vm1524_vm5, %v3790_v42, %v3788_v63  ;;  %v1757_v45 = vadd.f32 %v3792_v46, %v1657_v43  ;;  %v3497_v29 = vadd.f32 %v1805_v56, %v1745_v48  ;;  %v3795_v62 = vrot.slane %v3794_v40, 2  ;;  %v2332_v0 = vpop.eup %2331  ;;  %v3816_v63 = vld [vmem:[#allocation49_spill] sm:$0xff] }
 0x1e2   : > { %v1888_v2 = vsub.f32 %v1864_v59, %v1876_v38  ;;  %v3501_v15 = vadd.f32 %v1809_v25, %v1749_v4  ;;  %v1505_v60 = vadd.f32 %v3797_v55, %v3796_v1  ;;  %v1509_v54 = vadd.f32 %v3799_v18, %v3798_v6  ;;  %v3827_v55 = vld [vmem:[#allocation69_spill] sm:$0xff] }
 0x1e3   : > { %v1853_v61 = vadd.f32 %v3795_v62, %v1753_v31  ;;  %v1895_v17 = vadd.f32 0.0001, %v1891_v28  ;;  %v1621_v3 = vadd.f32 %v1575_v21, %v1520_v50  ;;  %v1865_v13 = vmul.f32 %v3497_v29, %v3497_v29  ;;  %v3812_v50 = vld [vmem:[#allocation29_spill] sm:$0xff]  ;;  %v3817_v21 = vld [vmem:[#allocation67_spill] sm:$0xff] }
 0x1e4   : > { %v3801_v47 = vrot.slane %v3800_v35, 7  ;;  %v3803_v27 = vrot.slane %v3802_v11, 7  ;;  %v3805_v14 = vrot.slane %v3804_v39, 2  ;;  %v1869_v30 = vmul.f32 %v3501_v15, %v3501_v15  ;;  %v3831_v11 = vld [vmem:[#allocation54_spill] sm:$0xff]  ;;  %v3833_v39 = vld [vmem:[#allocation21_spill] sm:$0xff] }
 0x1e5   : > { %v3807_v44 = vrot.slane %v3806_v36, 7  ;;  %v3809_v37 = vrot.slane %v3808_v57, 7  ;;  %v1654_v23 = vadd.f32 %v3810_v16, %v1614_v24  ;;  %v1907_v20 = vmul.f32 %v1903_v10, %v1895_v17  ;;  %v3823_v10 = vld [vmem:[#allocation19_spill] sm:$0xff] }
 0x1e6   : > { %v1530_v51 = vsel %vm1524_vm5, %v3803_v27, %v3801_v47  ;;  %v1857_v32 = vadd.f32 %v3805_v14, %v1757_v45  ;;  %v1877_v9 = vsub.f32 %v1853_v61, %v1865_v13  ;;  %v1935_v26 = vmul.f32 %v2332_v0, %v3438_v5  ;;  %v3819_v5 = vld [vmem:[#allocation58_spill] sm:$0xff] }
 0x1e7   : > { %v1542_v43 = vsel %vm1524_vm5, %v3809_v37, %v3807_v44  ;;  %v1606_v28 = vadd.f32 %v1530_v51, %v1505_v60  ;;  %v1900_v58 = vmul.f32 2.0, %v1888_v2  ;;  %v1658_v7 = vadd.f32 %v3812_v50, %v3811_v19  ;;  %v3825_v61 = vld [vmem:[#allocation42_spill] sm:$0xff] }
 0x1e8   : > { %v1610_v59 = vadd.f32 %v1542_v43, %v1509_v54  ;;  %v1881_v31 = vsub.f32 %v1857_v32, %v1869_v30  ;;  %v1661_v48 = vadd.f32 %v3813_v8, %v1621_v3  ;;  %v1909_v49 = vadd.f32 %v1869_v30, %v1865_v13  ;;  %v3829_v3 = vld [vmem:[#allocation30_spill] sm:$0xff]  ;;  %v3835_v30 = vld [vmem:[#allocation44_spill] sm:$0xff] }
 0x1e9   : > { %v1646_v4 = vadd.f32 %v3814_v33, %v1606_v28  ;;  %v1939_v22 = vsub.f32 2.0, %v1935_v26  ;;  %v1781_v12 = vmul.f32 0.0010283801, %v3816_v63  ;;  %v1521_v46 = vadd.f32 %v3818_v41, %v3817_v21  ;;  %v3837_v28 = vld [vmem:[#allocation70_spill] sm:$0xff]  ;;  %v3842_v63 = vld [vmem:[#allocation57_spill] sm:$0xff] }
 0x1ea   : > { %v1650_v56 = vadd.f32 %v3815_v53, %v1610_v59  ;;  %v1917_v42 = vadd.f32 %v1881_v31, %v1877_v9  ;;  %v3820_v45 = vrot.slane %v3819_v5, 7  ;;  %v3822_v25 = vrot.slane %v3821_v34, 7  ;;  %v3839_v59 = vld [vmem:[#allocation31_spill] sm:$0xff] }
 0x1eb   : > { %v3824_v40 = vrot.slane %v3823_v10, 1  ;;  %v3826_v2 = vrot.slane %v3825_v61, 1  ;;  %v3828_v60 = vrot.slane %v3827_v55, 1  ;;  %v1943_v18 = vmul.f32 %v2332_v0, %v1939_v22 }
 0x1ec   : > { %v1578_v24 = vsel %vm1524_vm5, %v3822_v25, %v3820_v45  ;;  %v1913_v54 = vadd.f32 0.0001, %v1909_v49  ;;  %v1921_v17 = vadd.f32 0.0009, %v1917_v42  ;;  %v3830_v13 = vrot.slane %v3829_v3, 1  ;;  %v3843_v42 = vld [vmem:[#allocation59_spill] sm:$0xff] }
 0x1ed   : > { %v1746_v62 = vadd.f32 %v3824_v40, %v1646_v4  ;;  %v1750_v1 = vadd.f32 %v3826_v2, %v1650_v56  ;;  %v1754_v6 = vadd.f32 %v3828_v60, %v1654_v23  ;;  %v1892_v47 = vmul.f32 2.0, %v1876_v38  ;;  %v2334_v23 = vpop.eup %2333  ;;  %v3841_v56 = vld [vmem:[#allocation62_spill] sm:$0xff] }
 0x1ee   : > { %v1758_v35 = vadd.f32 %v3830_v13, %v1658_v7  ;;  %v3832_v27 = vrot.slane %v3831_v11, 1  ;;  %v3834_v14 = vrot.slane %v3833_v39, 2  ;;  %v3836_v36 = vrot.slane %v3835_v30, 2 }
 0x1ef   : > { %v1947_v57 = vmul.f32 %v1943_v18, %v1907_v20  ;;  %v1821_v37 = vrot.slane %v1781_v12, 2  ;;  %v1925_v43 = vmul.f32 %v1921_v17, %v1913_v54  ;;  %v3838_v0 = vrot.slane %v3837_v28, 2 }
 0x1f0   : > { %v1761_v51 = vadd.f32 %v3832_v27, %v1661_v48  ;;  %v1846_v32 = vadd.f32 %v3834_v14, %v1746_v62  ;;  %v1850_v44 = vadd.f32 %v3836_v36, %v1750_v1  ;;  %v1622_v9 = vadd.f32 %v1578_v24, %v1521_v46 }
 0x1f1   : > { %v1854_v16 = vadd.f32 %v3838_v0, %v1754_v6  ;;  %v3840_v26 = vrot.slane %v3839_v59, 2  ;;  %v1956_v50 = vsel %vm1949_vm6, %v1947_v57, 0.0  ;;  %v1904_v7 = vadd.f32 0.0009, %v1900_v58 }
 0x1f2   : > { %v1866_v31 = vmul.f32 %v1846_v32, %v1846_v32  ;;  %v1870_v19 = vmul.f32 %v1850_v44, %v1850_v44  ;;  %v1936_v8 = vmul.f32 %v2334_v23, %v3478_v52  ;;  %2335 = vrcp.f32 %v1925_v43  ;;  %1957 = vadd.xlane.f32.xlu1 %v1956_v50 }
 0x1f3   : > { %v1858_v38 = vadd.f32 %v3840_v26, %v1758_v35  ;;  %v1896_v33 = vadd.f32 0.0001, %v1892_v47  ;;  %v1861_v53 = vadd.f32 %v1821_v37, %v1761_v51  ;;  %v1722_v22 = vrot.slane %v3841_v56, 1 }
 0x1f4   : > { %v1878_v20 = vsub.f32 %v1854_v16, %v1866_v31  ;;  %v1910_v49 = vadd.f32 %v1870_v19, %v1866_v31  ;;  %v1940_v4 = vsub.f32 2.0, %v1936_v8  ;;  %v1782_v12 = vmul.f32 0.0010283801, %v3842_v63 }
 0x1f5   : > { %v1882_v48 = vsub.f32 %v1858_v38, %v1870_v19  ;;  %v1662_v21 = vadd.f32 %v3843_v42, %v1622_v9  ;;  %v1908_v46 = vmul.f32 %v1904_v7, %v1896_v33  ;;  %v1873_v52 = vmul.f32 %v3501_v15, %v3497_v29 }
 0x1f6   : > { %v1944_v5 = vmul.f32 %v2334_v23, %v1940_v4  ;;  %v1914_v58 = vadd.f32 0.0001, %v1910_v49  ;;  %v1822_v10 = vrot.slane %v1782_v12, 2  ;;  %v1874_v60 = vmul.f32 %v1850_v44, %v1846_v32 }
 0x1f7   : > { %v1918_v41 = vadd.f32 %v1882_v48, %v1878_v20  ;;  %v1885_v25 = vsub.f32 %v1861_v53, %v1873_v52  ;;  %v1762_v24 = vadd.f32 %v1722_v22, %v1662_v21  ;;  %v1889_v1 = vmul.f32 2.0, %v1873_v52 }
 0x1f8   : > { %v1948_v34 = vmul.f32 %v1944_v5, %v1908_v46  ;;  %v1890_v47 = vmul.f32 2.0, %v1874_v60  ;;  %v1966_v37 = vlaneseq }
 0x1f9   : > { %v1922_v45 = vadd.f32 0.0009, %v1918_v41  ;;  %v1897_v61 = vmul.f32 2.0, %v1885_v25  ;;  %v1862_v2 = vadd.f32 %v1822_v10, %v1762_v24  ;;  %v1893_v29 = vadd.f32 0.0001, %v1889_v1 }
 0x1fa   : > { %v1959_v62 = vsel %vm1949_vm6, %v1948_v34, 0.0  ;;  %v1894_v14 = vadd.f32 0.0001, %v1890_v47  ;;  %v1969_v28 = vshrl.u32 %v1966_v37, 7 }
 0x1fb   : > { %v1926_v40 = vmul.f32 %v1922_v45, %v1914_v58  ;;  %1960 = vadd.xlane.f32.xlu1 %v1959_v62  ;;  %v1901_v6 = vadd.f32 0.0009, %v1897_v61  ;;  %v1886_v54 = vsub.f32 %v1862_v2, %v1874_v60 }
 0x1fd   : > { %2337 = vrcp.f32 %v1926_v40  ;;  %v1905_v17 = vmul.f32 %v1901_v6, %v1893_v29  ;;  %v1898_v13 = vmul.f32 2.0, %v1886_v54 }
 0x1ff   : > { %v2336_v55 = vpop.eup %2335  ;;  %v1902_v51 = vadd.f32 0.0009, %v1898_v13 }
 0x200   : > { %v1933_v18 = vmul.f32 %v2336_v55, %v1925_v43  ;;  %v1967_v43 = vand.u32 127, %v1966_v37 }
 0x201   : > { %v1906_v36 = vmul.f32 %v1902_v51, %v1894_v14 }
 0x202   : > { %v1937_v15 = vsub.f32 2.0, %v1933_v18  ;;  %v1970_v23 = vsub.s32 %v1967_v43, %v1969_v28 }
 0x204   : > { %v1941_v3 = vmul.f32 %v2336_v55, %v1937_v15 }
 0x206   : > { %v1945_v35 = vmul.f32 %v1941_v3, %v1905_v17 }
 0x208   : > { %v1950_v27 = vsel %vm1949_vm6, %v1945_v35, 0.0 }
 0x209   : > { %1951 = vadd.xlane.f32.xlu0 %v1950_v27 }
 0x20a   : > { %v2338_v11 = vpop.eup %2337 }
 0x20b   : > { %v1934_v39 = vmul.f32 %v2338_v11, %v1926_v40 }
 0x20d   : > { %v1938_v30 = vsub.f32 2.0, %v1934_v39 }
 0x20f   : > { %v1942_v32 = vmul.f32 %v2338_v11, %v1938_v30 }
 0x211   : > { %v1946_v44 = vmul.f32 %v1942_v32, %v1906_v36 }
 0x213   : > { %v1953_v57 = vsel %vm1949_vm6, %v1946_v44, 0.0 }
 0x214   : > { %1954 = vadd.xlane.f32.xlu0 %v1953_v57 }
 0x27b   : > { %v1958_v0 = vpop.xlane.xlu1 %1957 }
 0x27c   : > { %v1979_v31 = vrot.slane %v1958_v0, %v1970_v23 }
 0x284   : > { %v1961_v9 = vpop.xlane.xlu1 %1960 }
 0x285   : > { %v1983_v19 = vrot.slane %v1961_v9, %v1970_v23 }
 0x292   : > { %v1952_v16 = vpop.xlane.xlu0 %1951 }
 0x293   : > { %v1971_v26 = vrot.slane %v1952_v16, %v1970_v23 }
 0x29d   : > { %v1955_v59 = vpop.xlane.xlu0 %1954 }
 0x29e   : > { %v1975_v38 = vrot.slane %v1955_v59, %v1970_v23 }
 0x2a0   : > { %v1985_v50 = vsel %vm1984_vm7, %v1975_v38, %v1971_v26 }
 0x2a1   : > { %v1987_v7 = vsel %vm1986_vm8, %v1979_v31, %v1985_v50 }
 0x2a2   : > { %v1989_v8 = vsel %vm1988_vm9, %v1983_v19, %v1987_v7 }
 0x2a3   : > { %v1992_v20 = vsel %vm1991_vm10, %v1989_v8, 0.0 }
 0x2a4   : > { %1993 = vadd.xlane.f32.xlu0 %v1992_v20 }
 0x32d   : > { %v1994_v48 = vpop.xlane.xlu0 %1993 }
 0x32e   : > { %v1995_v49 = vmul.f32 0.027777778, %v1994_v48 }
 0x330   : > { %v1996_v33 = vmax.f32 %v1995_v49, 0.0 }
 0x332   : > { %v2001_v4 = vrot.slane %v1996_v33, %v1970_v23 }
 0x334   : > { %2004 = vst.msk [vmem:[%s229_s4] sm:$0x1] %vm2003_vm11, %v2001_v4 }
 0x335   : > { %2408 = shalt.err (!%p2405_p4)
}
 0x336   : > { %s2409_s27 = scalar_lea.hbm %s2016_s28, 16  ;;  %s2413_s9 = scalar_lea.hbm %s3605_s3, 32 }
 0x337   : > { %p2410_p9 = scmp.ne.s32.totalorder %s2016_s28, %s2409_s27  ;;  %p2414_p5 = scmp.lt.s32.totalorder %s2016_s28, %s3605_s3 }
 0x338   : > { %p2415_p8 = scmp.lt.s32.totalorder %s2413_s9, %s2409_s27 }
 0x339   : > { %p2411_p11 = pnand %p2410_p9, %p3844_p1 }
 0x33a   : > { %p2416_p6 = por %p2415_p8, %p2414_p5 }
 0x33b   : > { %p2412_p3 = pneg %p2411_p11 }
 0x33d   : > { %p2417_p13 = pnand %p2416_p6, %p2412_p3 }
 0x33f   : > { %2420 = shalt.err (!%p2417_p13)
}
 0x340   : > { %2282 = dma.vmem_to_hbm [thread:$0]  (%p3844_p1), %s2019_s5, 16, %s2016_s28, %s2006_s19  }
 0x341 PF: > { %s2030_s20 = sand.u32 1, %s2451_s12   ;;  %p3845_p12 = scmp.ne.s32.totalorder %s3646_s25, 0 }
 0x342   : > { %p3846_p7 = scmp.ge.s32.totalorder %s2463_s15, 2  ;;  %s2031_s29 = scalar_lea.sflag [#allocation4], %s2030_s20 }
 0x344   : > { %p2292_p10 = pnand %p3846_p7, %p3845_p12 }
 0x346   : > { %p2293_p0 = pneg %p2292_p10 }
 0x348   : > { %2446 = dma.done.wait (%p2293_p0), %s2031_s29, 16  }
 0x349   : > { %2448 = vsyncadd (%p2293_p0), %s2031_s29, 4294967280  ;;  %p19_p2 = scmp.ge.s32.totalorder %s2515_s18, 4   ;;  %s3847_s12 = smov %s2455_s13 }
 0x34a   : > { %s3848_s13 = smov %s2459_s14  ;;  %s3849_s14 = smov %s2527_s21 }
 0x34b   : > { %s3850_s15 = smov %s2515_s18  ;;  %21 = sbr.rel (!%p19_p2) target bundleno = 7 (0x7), region = 90 }
 0x350   :  { %2035 = vsyncpa [#allocation3], 1 }
 0x351   :  { %2037 = vsyncpa [#allocation3 + $0x1], 1 }
 0x352   :  { %2038 = vsyncpa [#allocation6], 1 }
 0x353   :  { %2040 = vsyncpa [#allocation6 + $0x1], 1 }
 0x354   :  { %2041 = vsyncpa [#allocation4], 1 }
 0x355   :  { %2043 = vsyncpa [#allocation4 + $0x1], 1 }

</bundles_post_ra>
